<compile_context>
chip_gen: v5e
topology: v5e:2x2
jax: 0.10.0
libtpu: 0.0.40
codegen_flags: <defaults>
</compile_context>

<pallas_src>
import functools
import math

import jax
import jax.numpy as jnp
from jax.experimental import pallas as pl
from jax.experimental.pallas import tpu as pltpu

H1, H2, H3 = 512, 512, 64
MAX_K_TILE = 2048          # above this, input_dim is streamed in K tiles
K_TILE = 1024              # K tile size for the streamed case


def _elu(z):
    # ELU(alpha=1), forward only: exp overflow in the unselected branch is
    # discarded by the select.
    return jnp.where(z > 0, z, jnp.exp(z) - 1.0)


def dqn_two_kernel(x_ref,
                   w1_ref, b1_ref,
                   w2_ref, b2_ref,
                   w3_ref, b3_ref,
                   w4_ref, b4_ref,
                   o_ref,
                   acc_ref,
                   *, elem_dtype):
    k = pl.program_id(1)

    @pl.when(k == 0)
    def _():
        acc_ref[...] = jnp.zeros_like(acc_ref)

    # layer 1 partial product: (tm, tk) @ (tk, 512), f32 accumulate in VMEM.
    acc_ref[...] += jnp.dot(x_ref[...].astype(jnp.bfloat16), w1_ref[...],
                            preferred_element_type=jnp.float32)

    @pl.when(k == pl.num_programs(1) - 1)
    def _():
        # layer 1 finalize: bias + ReLU, emitted directly as bf16 for the MXU.
        h1 = jnp.maximum(acc_ref[...] + b1_ref[...], 0.0).astype(jnp.bfloat16)

        # layer 2: Linear(512, 512) + ELU (elementwise in elem_dtype).
        h2 = _elu((jnp.dot(h1, w2_ref[...], preferred_element_type=jnp.float32)
                   + b2_ref[...]).astype(elem_dtype)).astype(jnp.bfloat16)

        # layer 3: Linear(512, 64) + ELU.
        h3 = _elu((jnp.dot(h2, w3_ref[...], preferred_element_type=jnp.float32)
                   + b3_ref[...]).astype(elem_dtype))

        # layer 4: Linear(64, 1) as a VPU lane reduction (w4 row in f32).
        out = (jnp.sum(h3.astype(jnp.float32) * w4_ref[...],
                       axis=-1, keepdims=True) + b4_ref[...])
        o_ref[...] = out.astype(o_ref.dtype)


def _round_up(x, m):
    return (x + m - 1) // m * m


def _device_kind():
    try:
        return jax.devices()[0].device_kind.lower()
    except Exception:
        return ""


def _default_elem_dtype():
    # bf16 VPU/EUP exist on v6e/v7x; keep f32 elementwise on older chips.
    kind = _device_kind()
    if "v6" in kind or "v7" in kind or "tpu7" in kind:
        return jnp.bfloat16
    return jnp.float32


def _min_batch_tiles():
    # v7x has 2 TensorCores per chip; make sure the "parallel" batch axis has
    # at least 2 tiles so both cores get work.  No-op elsewhere.
    kind = _device_kind()
    return 2 if ("v7" in kind or "tpu7" in kind) else 1


def _pick_batch_tiling(bs, tile_m, min_tiles):
    # Balance tiles to minimise padding; honour min_tiles when each tile
    # would still hold >= 8 rows.
    n = max(1, -(-bs // tile_m))
    if min_tiles > 1 and bs >= 8 * min_tiles:
        n = max(n, min_tiles)
    tm = _round_up(-(-bs // n), 8)
    n = -(-bs // tm)
    return tm, n, tm * n


def _vmem_limit_bytes(tm, tk, x_bytes):
    buf = 2                                           # BlockSpec double-buffering
    fixed = (H1 * H2 + H2 * H3) * 2 * buf             # w2, w3 (bf16)
    fixed += (H1 + H2 + H3 + H3 + 1) * 4 * buf        # biases + w4 row (f32)
    stream = tm * tk * x_bytes * buf                  # x tiles
    stream += tk * H1 * 2 * buf                       # w1 tiles (bf16)
    scratch = tm * H1 * 4                             # layer-1 accumulator
    temps = tm * (H1 * 2 + H2 * 6 + H3 * 10)          # activation temporaries
    out = tm * 4 * buf
    total = fixed + stream + scratch + temps + out + (8 << 20)
    return max(16 << 20, min(total, 100 << 20))


def dqn_two_forward(x, params, *, tile_m=1024, elem_dtype=None):
    """x: (B, ...) -> flattened to (B, input_dim); params as from init_params."""
    if elem_dtype is None:
        elem_dtype = _default_elem_dtype()

    bs = x.shape[0]
    x = x.reshape(bs, -1)                              # mirrors x.view(bs, -1)
    if x.dtype != jnp.bfloat16:                        # keep bf16 inputs as-is
        x = x.astype(jnp.float32)
    in_dim = x.shape[1]
    x_bytes = jnp.dtype(x.dtype).itemsize

    # Batch tiling (balanced, >= 2 tiles on v7x when possible).
    tm, num_m, bp = _pick_batch_tiling(bs, tile_m, _min_batch_tiles())

    # K tiling over input_dim for layer 1 (only kicks in for large inputs).
    if in_dim <= MAX_K_TILE:
        tk, kp = in_dim, in_dim
    else:
        tk = K_TILE
        kp = _round_up(in_dim, tk)
    num_k = kp // tk

    pad_b, pad_k = bp - bs, kp - in_dim
    if pad_b or pad_k:
        x = jnp.pad(x, ((0, pad_b), (0, pad_k)))

    # bf16 weights for the three large matmuls; final projection stays f32.
    w1 = params["w1"].astype(jnp.bfloat16)
    if pad_k:
        w1 = jnp.pad(w1, ((0, pad_k), (0, 0)))
    w2 = params["w2"].astype(jnp.bfloat16)
    w3 = params["w3"].astype(jnp.bfloat16)
    w4_row = params["w4"].reshape(1, H3).astype(jnp.float32)
    b1 = params["b1"].astype(jnp.float32)
    b2 = params["b2"].astype(jnp.float32)
    b3 = params["b3"].astype(jnp.float32)
    b4 = params["b4"].reshape(1, 1).astype(jnp.float32)

    def resident(shape):
        # Whole-array block, constant block index -> DMA'd once, VMEM-resident.
        return pl.BlockSpec(shape, lambda i, k: (0, 0))

    flops = 2 * bp * (kp * H1 + H1 * H2 + H2 * H3 + H3)
    transcendentals = bp * (H2 + H3)                   # exp in the two ELUs
    bytes_accessed = (bp * kp * x_bytes + bp * 4
                      + (kp * H1 + H1 * H2 + H2 * H3) * 2
                      + (H1 + H2 + H3 + H3 + 1) * 4)

    kernel = functools.partial(dqn_two_kernel, elem_dtype=elem_dtype)

    out = pl.pallas_call(
        kernel,
        out_shape=jax.ShapeDtypeStruct((bp, 1), jnp.float32),
        grid=(num_m, num_k),
        in_specs=[
            pl.BlockSpec((tm, tk), lambda i, k: (i, k)),     # x tile
            pl.BlockSpec((tk, H1), lambda i, k: (k, 0)),     # w1 K-tile
            resident(b1.shape),
            resident(w2.shape), resident(b2.shape),
            resident(w3.shape), resident(b3.shape),
            resident(w4_row.shape), resident(b4.shape),
        ],
        out_specs=pl.BlockSpec((tm, 1), lambda i, k: (i, 0)),
        scratch_shapes=[pltpu.VMEM((tm, H1), jnp.float32)],  # layer-1 accumulator
        compiler_params=pltpu.CompilerParams(
            dimension_semantics=("parallel", "arbitrary"),
            vmem_limit_bytes=_vmem_limit_bytes(tm, tk, x_bytes),
        ),
        cost_estimate=pl.CostEstimate(
            flops=flops,
            transcendentals=transcendentals,
            bytes_accessed=bytes_accessed,
        ),
    )(x, w1, b1, w2, b2, w3, b3, w4_row, b4)

    return out[:bs]


def xavier_uniform(key, fan_in, fan_out, dtype=jnp.float32):
    bound = math.sqrt(6.0 / (fan_in + fan_out))
    # Stored as (in, out) — the transpose of PyTorch's (out, in) layout.
    return jax.random.uniform(key, (fan_in, fan_out), dtype=dtype,
                              minval=-bound, maxval=bound)


def init_params(key, input_dim):
    k1, k2, k3, k4 = jax.random.split(key, 4)
    return {
        "w1": xavier_uniform(k1, input_dim, H1),
        "b1": jnp.zeros((1, H1), jnp.float32),
        "w2": xavier_uniform(k2, H1, H2),
        "b2": jnp.zeros((1, H2), jnp.float32),
        "w3": xavier_uniform(k3, H2, H3),
        "b3": jnp.zeros((1, H3), jnp.float32),
        "w4": xavier_uniform(k4, H3, 1),
        "b4": jnp.zeros((1, 1), jnp.float32),
    }


def reference_forward(x, params, elem_dtype=jnp.bfloat16):
    """Pure-JAX reference with the same bf16-MXU / elementwise dtype flow."""
    bs = x.shape[0]
    h = x.reshape(bs, -1).astype(jnp.float32)

    def mm(a, w):
        return jnp.dot(a.astype(jnp.bfloat16), w.astype(jnp.bfloat16),
                       preferred_element_type=jnp.float32)

    h1 = jnp.maximum(mm(h, params["w1"]) + params["b1"], 0.0)
    h2 = _elu((mm(h1, params["w2"]) + params["b2"]).astype(elem_dtype))
    h3 = _elu((mm(h2, params["w3"]) + params["b3"]).astype(elem_dtype))
    w4_row = params["w4"].reshape(1, H3).astype(jnp.float32)
    return (jnp.sum(h3.astype(jnp.float32) * w4_row, axis=-1, keepdims=True)
            + params["b4"].reshape(1, 1))


if __name__ == "__main__":
    key = jax.random.PRNGKey(0)
    kx, kp = jax.random.split(key)

    batch = 8
    input_dim = 32

    x = jax.random.normal(kx, (batch, input_dim), dtype=jnp.float32)
    params = init_params(kp, input_dim)

    elem_dtype = _default_elem_dtype()
    out = jax.block_until_ready(dqn_two_forward(x, params, elem_dtype=elem_dtype))

    ref = reference_forward(x, params, elem_dtype=elem_dtype)
    assert out.shape == (batch, 1)
    assert jnp.allclose(out, ref, atol=2e-2, rtol=2e-2), (
        float(jnp.max(jnp.abs(out - ref))))

    print("KERNEL_OK")
</pallas_src>

<mosaic_0001>
module attributes {stable_mosaic.version = 11 : i64} {
  func.func @dqn_two_kernel(%arg0: i32, %arg1: i32, %arg2: memref<8x32xf32, #tpu.memory_space<vmem>>, %arg3: memref<32x512xbf16, #tpu.memory_space<vmem>>, %arg4: memref<1x512xf32, #tpu.memory_space<vmem>>, %arg5: memref<512x512xbf16, #tpu.memory_space<vmem>>, %arg6: memref<1x512xf32, #tpu.memory_space<vmem>>, %arg7: memref<512x64xbf16, #tpu.memory_space<vmem>>, %arg8: memref<1x64xf32, #tpu.memory_space<vmem>>, %arg9: memref<1x64xf32, #tpu.memory_space<vmem>>, %arg10: memref<1x1xf32, #tpu.memory_space<vmem>>, %arg11: memref<8x1xf32, #tpu.memory_space<vmem>>, %arg12: memref<8x512xf32, #tpu.memory_space<vmem>>) attributes {dimension_semantics = [#tpu.dimension_semantics<parallel>, #tpu.dimension_semantics<arbitrary>], iteration_bounds = array<i64: 1, 1>, scalar_prefetch = 0 : i64, scratch_operands = 1 : i64, tpu.core_type = #tpu.core_type<tc>, window_params = [{transform_indices = @transform_0, window_bounds = array<i64: 8, 32>}, {transform_indices = @transform_1, window_bounds = array<i64: 32, 512>}, {pipeline_mode = #tpu.pipeline_mode<synchronous>, transform_indices = @transform_2, window_bounds = array<i64: 1, 512>}, {pipeline_mode = #tpu.pipeline_mode<synchronous>, transform_indices = @transform_3, window_bounds = array<i64: 512, 512>}, {pipeline_mode = #tpu.pipeline_mode<synchronous>, transform_indices = @transform_4, window_bounds = array<i64: 1, 512>}, {pipeline_mode = #tpu.pipeline_mode<synchronous>, transform_indices = @transform_5, window_bounds = array<i64: 512, 64>}, {pipeline_mode = #tpu.pipeline_mode<synchronous>, transform_indices = @transform_6, window_bounds = array<i64: 1, 64>}, {pipeline_mode = #tpu.pipeline_mode<synchronous>, transform_indices = @transform_7, window_bounds = array<i64: 1, 64>}, {pipeline_mode = #tpu.pipeline_mode<synchronous>, transform_indices = @transform_8, window_bounds = array<i64: 1, 1>}, {transform_indices = @transform_9, window_bounds = array<i64: 8, 1>}]} {
    %c0_i32 = arith.constant 0 : i32
    %0 = arith.cmpi eq, %arg1, %c0_i32 : i32
    %1 = arith.extui %0 : i1 to i32
    %c0_i32_0 = arith.constant 0 : i32
    %2 = arith.cmpi ne, %1, %c0_i32_0 : i32
    scf.if %2 {
      %cst_10 = arith.constant 0.000000e+00 : f32
      %13 = vector.broadcast %cst_10 : f32 to vector<8x512xf32>
      %c0_11 = arith.constant 0 : index
      %c0_12 = arith.constant 0 : index
      %14 = vector.load %arg12[%c0_11, %c0_12] : memref<8x512xf32, #tpu.memory_space<vmem>>, vector<8x512xf32>
      tpu.vector_store %arg12[%c0_11, %c0_12], %13 {strides = array<i32>} : memref<8x512xf32, #tpu.memory_space<vmem>>, vector<8x512xf32>,
    } else {
    }
    %c0 = arith.constant 0 : index
    %c0_1 = arith.constant 0 : index
    %3 = vector.load %arg12[%c0, %c0_1] : memref<8x512xf32, #tpu.memory_space<vmem>>, vector<8x512xf32>
    %c0_2 = arith.constant 0 : index
    %c0_3 = arith.constant 0 : index
    %4 = vector.load %arg2[%c0_2, %c0_3] : memref<8x32xf32, #tpu.memory_space<vmem>>, vector<8x32xf32>
    %5 = arith.truncf %4 : vector<8x32xf32> to vector<8x32xbf16>
    %c0_4 = arith.constant 0 : index
    %c0_5 = arith.constant 0 : index
    %6 = vector.load %arg3[%c0_4, %c0_5] : memref<32x512xbf16, #tpu.memory_space<vmem>>, vector<32x512xbf16>
    %cst = arith.constant dense<0.000000e+00> : vector<8x512xf32>
    %7 = tpu.matmul %5, %6, %cst {dimension_numbers = #tpu.dot_dimension_numbers<[1], [0], [0], [1], [0, 0, 1, 1], [], []>} : vector<8x32xbf16>, vector<32x512xbf16>, vector<8x512xf32> -> vector<8x512xf32>
    %8 = arith.addf %3, %7 : vector<8x512xf32>
    %c0_6 = arith.constant 0 : index
    %c0_7 = arith.constant 0 : index
    %9 = vector.load %arg12[%c0_6, %c0_7] : memref<8x512xf32, #tpu.memory_space<vmem>>, vector<8x512xf32>
    tpu.vector_store %arg12[%c0_6, %c0_7], %8 {strides = array<i32>} : memref<8x512xf32, #tpu.memory_space<vmem>>, vector<8x512xf32>,
    %c0_i32_8 = arith.constant 0 : i32
    %10 = arith.cmpi eq, %arg1, %c0_i32_8 : i32
    %11 = arith.extui %10 : i1 to i32
    %c0_i32_9 = arith.constant 0 : i32
    %12 = arith.cmpi ne, %11, %c0_i32_9 : i32
    scf.if %12 {
      %c0_10 = arith.constant 0 : index
      %c0_11 = arith.constant 0 : index
      %13 = vector.load %arg12[%c0_10, %c0_11] : memref<8x512xf32, #tpu.memory_space<vmem>>, vector<8x512xf32>
      %c0_12 = arith.constant 0 : index
      %c0_13 = arith.constant 0 : index
      %14 = vector.load %arg4[%c0_12, %c0_13] : memref<1x512xf32, #tpu.memory_space<vmem>>, vector<1x512xf32>
      %15 = vector.broadcast %14 : vector<1x512xf32> to vector<8x512xf32>
      %16 = arith.addf %13, %15 : vector<8x512xf32>
      %cst_14 = arith.constant 0.000000e+00 : f32
      %17 = vector.broadcast %cst_14 : f32 to vector<8x512xf32>
      %18 = arith.maximumf %16, %17 : vector<8x512xf32>
      %19 = arith.truncf %18 : vector<8x512xf32> to vector<8x512xbf16>
      %c0_15 = arith.constant 0 : index
      %c0_16 = arith.constant 0 : index
      %20 = vector.load %arg5[%c0_15, %c0_16] : memref<512x512xbf16, #tpu.memory_space<vmem>>, vector<512x512xbf16>
      %cst_17 = arith.constant dense<0.000000e+00> : vector<8x512xf32>
      %21 = tpu.matmul %19, %20, %cst_17 {dimension_numbers = #tpu.dot_dimension_numbers<[1], [0], [0], [1], [0, 0, 1, 1], [], []>} : vector<8x512xbf16>, vector<512x512xbf16>, vector<8x512xf32> -> vector<8x512xf32>
      %c0_18 = arith.constant 0 : index
      %c0_19 = arith.constant 0 : index
      %22 = vector.load %arg6[%c0_18, %c0_19] : memref<1x512xf32, #tpu.memory_space<vmem>>, vector<1x512xf32>
      %23 = vector.broadcast %22 : vector<1x512xf32> to vector<8x512xf32>
      %24 = arith.addf %21, %23 : vector<8x512xf32>
      %cst_20 = arith.constant 0.000000e+00 : f32
      %25 = vector.broadcast %cst_20 : f32 to vector<8x512xf32>
      %26 = arith.cmpf ogt, %24, %25 : vector<8x512xf32>
      %27 = math.exp %24 : vector<8x512xf32>
      %cst_21 = arith.constant 1.000000e+00 : f32
      %28 = vector.broadcast %cst_21 : f32 to vector<8x512xf32>
      %29 = arith.subf %27, %28 : vector<8x512xf32>
      %30 = arith.select %26, %24, %29 : vector<8x512xi1>, vector<8x512xf32>
      %31 = arith.truncf %30 : vector<8x512xf32> to vector<8x512xbf16>
      %c0_22 = arith.constant 0 : index
      %c0_23 = arith.constant 0 : index
      %32 = vector.load %arg7[%c0_22, %c0_23] : memref<512x64xbf16, #tpu.memory_space<vmem>>, vector<512x64xbf16>
      %cst_24 = arith.constant dense<0.000000e+00> : vector<8x64xf32>
      %33 = tpu.matmul %31, %32, %cst_24 {dimension_numbers = #tpu.dot_dimension_numbers<[1], [0], [0], [1], [0, 0, 1, 1], [], []>} : vector<8x512xbf16>, vector<512x64xbf16>, vector<8x64xf32> -> vector<8x64xf32>
      %c0_25 = arith.constant 0 : index
      %c0_26 = arith.constant 0 : index
      %34 = vector.load %arg8[%c0_25, %c0_26] : memref<1x64xf32, #tpu.memory_space<vmem>>, vector<1x64xf32>
      %35 = vector.broadcast %34 : vector<1x64xf32> to vector<8x64xf32>
      %36 = arith.addf %33, %35 : vector<8x64xf32>
      %cst_27 = arith.constant 0.000000e+00 : f32
      %37 = vector.broadcast %cst_27 : f32 to vector<8x64xf32>
      %38 = arith.cmpf ogt, %36, %37 : vector<8x64xf32>
      %39 = math.exp %36 : vector<8x64xf32>
      %cst_28 = arith.constant 1.000000e+00 : f32
      %40 = vector.broadcast %cst_28 : f32 to vector<8x64xf32>
      %41 = arith.subf %39, %40 : vector<8x64xf32>
      %42 = arith.select %38, %36, %41 : vector<8x64xi1>, vector<8x64xf32>
      %c0_29 = arith.constant 0 : index
      %c0_30 = arith.constant 0 : index
      %43 = vector.load %arg9[%c0_29, %c0_30] : memref<1x64xf32, #tpu.memory_space<vmem>>, vector<1x64xf32>
      %44 = vector.broadcast %43 : vector<1x64xf32> to vector<8x64xf32>
      %45 = arith.mulf %42, %44 : vector<8x64xf32>
      %cst_31 = arith.constant dense<0.000000e+00> : vector<8xf32>
      %46 = vector.multi_reduction <add>, %45, %cst_31 [1] : vector<8x64xf32> to vector<8xf32>
      %47 = vector.shape_cast %46 : vector<8xf32> to vector<8x1xf32>
      %c0_32 = arith.constant 0 : index
      %c0_33 = arith.constant 0 : index
      %48 = vector.load %arg10[%c0_32, %c0_33] : memref<1x1xf32, #tpu.memory_space<vmem>>, vector<1x1xf32>
      %49 = vector.broadcast %48 : vector<1x1xf32> to vector<8x1xf32>
      %50 = arith.addf %47, %49 : vector<8x1xf32>
      %c0_34 = arith.constant 0 : index
      %c0_35 = arith.constant 0 : index
      %51 = vector.load %arg11[%c0_34, %c0_35] : memref<8x1xf32, #tpu.memory_space<vmem>>, vector<8x1xf32>
      tpu.vector_store %arg11[%c0_34, %c0_35], %50 {strides = array<i32>} : memref<8x1xf32, #tpu.memory_space<vmem>>, vector<8x1xf32>,
    } else {
    }
    return
  }
  func.func @transform_0(%arg0: i32, %arg1: i32) -> (i32, i32) {
    %c0_i32 = arith.constant 0 : i32
    return %arg0, %arg1 : i32, i32
  }
  func.func @transform_1(%arg0: i32, %arg1: i32) -> (i32, i32) {
    %c0_i32 = arith.constant 0 : i32
    %c0_i32_0 = arith.constant 0 : i32
    return %arg1, %c0_i32 : i32, i32
  }
  func.func @transform_2(%arg0: i32, %arg1: i32) -> (i32, i32) {
    %c0_i32 = arith.constant 0 : i32
    %c0_i32_0 = arith.constant 0 : i32
    %c0_i32_1 = arith.constant 0 : i32
    return %c0_i32, %c0_i32_0 : i32, i32
  }
  func.func @transform_3(%arg0: i32, %arg1: i32) -> (i32, i32) {
    %c0_i32 = arith.constant 0 : i32
    %c0_i32_0 = arith.constant 0 : i32
    %c0_i32_1 = arith.constant 0 : i32
    return %c0_i32, %c0_i32_0 : i32, i32
  }
  func.func @transform_4(%arg0: i32, %arg1: i32) -> (i32, i32) {
    %c0_i32 = arith.constant 0 : i32
    %c0_i32_0 = arith.constant 0 : i32
    %c0_i32_1 = arith.constant 0 : i32
    return %c0_i32, %c0_i32_0 : i32, i32
  }
  func.func @transform_5(%arg0: i32, %arg1: i32) -> (i32, i32) {
    %c0_i32 = arith.constant 0 : i32
    %c0_i32_0 = arith.constant 0 : i32
    %c0_i32_1 = arith.constant 0 : i32
    return %c0_i32, %c0_i32_0 : i32, i32
  }
  func.func @transform_6(%arg0: i32, %arg1: i32) -> (i32, i32) {
    %c0_i32 = arith.constant 0 : i32
    %c0_i32_0 = arith.constant 0 : i32
    %c0_i32_1 = arith.constant 0 : i32
    return %c0_i32, %c0_i32_0 : i32, i32
  }
  func.func @transform_7(%arg0: i32, %arg1: i32) -> (i32, i32) {
    %c0_i32 = arith.constant 0 : i32
    %c0_i32_0 = arith.constant 0 : i32
    %c0_i32_1 = arith.constant 0 : i32
    return %c0_i32, %c0_i32_0 : i32, i32
  }
  func.func @transform_8(%arg0: i32, %arg1: i32) -> (i32, i32) {
    %c0_i32 = arith.constant 0 : i32
    %c0_i32_0 = arith.constant 0 : i32
    %c0_i32_1 = arith.constant 0 : i32
    return %c0_i32, %c0_i32_0 : i32, i32
  }
  func.func @transform_9(%arg0: i32, %arg1: i32) -> (i32, i32) {
    %c0_i32 = arith.constant 0 : i32
    %c0_i32_0 = arith.constant 0 : i32
    return %arg0, %c0_i32 : i32, i32
  }
}

</mosaic_0001>

<bundles_post_ra>
// kernel: tpu_custom_call.1
= control target key start
LH: loop header
LB: loop body
LE: loop exit
PB: predicated region body
PF: predicated region fallthrough
CT: control target
= control target key end

     0   :  { %s2700_s0 = inlined_call_operand.vmem [shape: f32[8,32], index: 0, kind: input, shape index: {}]   ;;  %s2701_s1 = inlined_call_operand.vmem [shape: bf16[32,512], index: 1, kind: input, shape index: {}]   ;;  %s2702_s2 = inlined_call_operand.vmem [shape: f32[1,512], index: 2, kind: input, shape index: {}]   ;;  %s2703_s3 = inlined_call_operand.hbm [shape: bf16[512,512], index: 3, kind: input, shape index: {}]   ;;  %s2704_s4 = inlined_call_operand.vmem [shape: f32[1,512], index: 4, kind: input, shape index: {}]   ;;  %s2705_s5 = inlined_call_operand.vmem [shape: bf16[512,64], index: 5, kind: input, shape index: {}]   ;;  %s2706_s6 = inlined_call_operand.vmem [shape: f32[1,64], index: 6, kind: input, shape index: {}]   ;;  %s2707_s7 = inlined_call_operand.vmem [shape: f32[1,64], index: 7, kind: input, shape index: {}]   ;;  %s2708_s8 = inlined_call_operand.<no memory space> [shape: f32[1,1], index: 8, kind: input, shape index: {}]   ;;  %s2709_s9 = inlined_call_operand.vmem [shape: f32[8,1], index: 9, kind: output, shape index: {}]  }
   0x1   :  { %v14_v0 = vstv %s2708_s8 }
   0x2   :  { %15 = vst [vmem:[#allocation3] sm:$0x1] %v14_v0 }
   0x3   :  { %16 = vsyncpa [#allocation5], 0  ;;  %s27_s13 = sshll.u32 %s2703_s3, 4  ;;  %s2445_s14 = smov [#allocation4]   ;;  %s28_s13 = int_to_ptr.hbm [resolvable:$true] %s27_s13 }
   0x4   :  { %s29_s15 = sshll.u32 %s2445_s14, 4  ;;  %s2446_s16 = smov 256   ;;  %s30_s15 = int_to_ptr.vmem [resolvable:$true] %s29_s15 }
   0x5   :  { %s2447_s17 = smov 16  }
   0x6   :  { %35 = dma.hbm_to_vmem [thread:$0]  %s28_s13, 16384, %s30_s15, [#allocation5], %s2446_s16, %s2446_s16, %s2447_s17  }
   0x7   :  { %2443 = dma.done.wait [#allocation5], 16384  }
   0x8   :  { %2444 = vsyncadd [#allocation5], 4294950912  ;;  %v1572_v1 = vld [vmem:[%s2701_s1 + $0x20] sm:$0xf]  ;;  %v2241_v2 = vld [vmem:[%s2701_s1 + $0x2c] sm:$0xf0] }
   0x9   :  { %v2239_v3 = vld [vmem:[%s2701_s1 + $0x24] sm:$0xf]  ;;  %v1573_v4 = vor.u32 %v2241_v2, %v1572_v1  ;;  %v1574_v5 = vld [vmem:[%s2701_s1 + $0x30] sm:$0xf0]  ;;  %v1580_v6 = vld [vmem:[%s2701_s1 + $0x28] sm:$0xf] }
   0xa   :  { %v2242_v7 = vld [vmem:[%s2701_s1 + $0x34] sm:$0xf0]  ;;  %v1577_v8 = vor.u32 %v2239_v3, %v1574_v5  ;;  %v2240_v10 = vld [vmem:[%s2701_s1 + $0x2c] sm:$0xf]  ;;  %v1582_v11 = vld [vmem:[%s2701_s1 + $0x38] sm:$0xf0] }
   0xb   :  { %v1581_v9 = vor.u32 %v2242_v7, %v1580_v6  ;;  %v1556_v12 = vld [vmem:[%s2701_s1] sm:$0xf]  ;;  %123 = vmatpush.bf16.msra.mxu0 %v1573_v4  ;;  %v1585_v13 = vor.u32 %v2240_v10, %v1582_v11  ;;  %v2237_v14 = vld [vmem:[%s2701_s1 + $0xc] sm:$0xf0]  ;;  %v2235_v15 = vld [vmem:[%s2701_s1 + $0x4] sm:$0xf] }
   0xc   :  { %v1558_v16 = vld [vmem:[%s2701_s1 + $0x10] sm:$0xf0]  ;;  %136 = vmatpush.bf16.msra.mxu1 %v1577_v8  ;;  %v1557_v17 = vor.u32 %v2237_v14, %v1556_v12  ;;  %v1564_v19 = vld [vmem:[%s2701_s1 + $0x8] sm:$0xf]  ;;  %v2238_v20 = vld [vmem:[%s2701_s1 + $0x14] sm:$0xf0] }
   0xd   :  { %149 = vmatpush.bf16.msra.mxu2 %v1581_v9  ;;  %v1561_v18 = vor.u32 %v2235_v15, %v1558_v16  ;;  %v2236_v21 = vld [vmem:[%s2701_s1 + $0xc] sm:$0xf]  ;;  %162 = vmatpush.bf16.msra.mxu3 %v1585_v13  ;;  %v1565_v22 = vor.u32 %v2238_v20, %v1564_v19  ;;  %v1566_v23 = vld [vmem:[%s2701_s1 + $0x18] sm:$0xf0]  ;;  %v63_v24 = vld [vmem:[%s2700_s0] sm:$0xff]  ;;  %vm113_vm0 = vcmask 261120  }
   0xe   :  { %v1704_v25 = vld [vmem:[#allocation4 + $0xe0] sm:$0xf]  ;;  %v1569_v26 = vor.u32 %v2236_v21, %v1566_v23  ;;  %v64_v27 = vpack.c.bf16 %v63_v24, %v63_v24  ;;  %v2273_v28 = vld [vmem:[#allocation4 + $0xec] sm:$0xf0]  ;;  %vm1538_vm6 = vcmask 523264   ;;  %vm1547_vm7 = vcmask 7168  }
   0xf   :  { %v1832_v29 = vld [vmem:[#allocation4 + $0x1e0] sm:$0xf]  ;;  %v2305_v30 = vld [vmem:[#allocation4 + $0x1ec] sm:$0xf0]  ;;  %124 = vmatpush.bf16.msra.mxu0 %v1557_v17  ;;  %v1705_v31 = vor.u32 %v2273_v28, %v1704_v25 }
  0x10   :  { %v1833_v32 = vor.u32 %v2305_v30, %v1832_v29  ;;  %v1688_v33 = vld [vmem:[#allocation4 + $0xc0] sm:$0xf]  ;;  %v2269_v34 = vld [vmem:[#allocation4 + $0xcc] sm:$0xf0]  ;;  %137 = vmatpush.bf16.msra.mxu1 %v1561_v18 }
  0x11   :  { %v1816_v35 = vld [vmem:[#allocation4 + $0x1c0] sm:$0xf]  ;;  %150 = vmatpush.bf16.msra.mxu2 %v1565_v22  ;;  %v2301_v36 = vld [vmem:[#allocation4 + $0x1cc] sm:$0xf0]  ;;  %163 = vmatpush.bf16.msra.mxu3 %v1569_v26  ;;  %v1689_v39 = vor.u32 %v2269_v34, %v1688_v33 }
  0x12   :  { %v1960_v37 = vld [vmem:[#allocation4 + $0x2e0] sm:$0xf]  ;;  %v2337_v38 = vld [vmem:[#allocation4 + $0x2ec] sm:$0xf0]  ;;  %1586 = vmatmul.msk.bf16.vlgmr.msra.gmra.mxu0 %vm113_vm0, %v64_v27  ;;  %v1817_v44 = vor.u32 %v2301_v36, %v1816_v35 }
  0x13   :  { %984 = vmatpush.bf16.msrb.mxu0 %v1705_v31  ;;  %v1961_v40 = vor.u32 %v2337_v38, %v1960_v37  ;;  %v2088_v41 = vld [vmem:[#allocation4 + $0x3e0] sm:$0xf]  ;;  %v2369_v42 = vld [vmem:[#allocation4 + $0x3ec] sm:$0xf0]  ;;  %1587 = vmatmul.msk.bf16.vlgmr.msra.gmra.mxu1 %vm113_vm0, %v64_v27 }
  0x14   :  { %v1672_v43 = vld [vmem:[#allocation4 + $0xa0] sm:$0xf]  ;;  %997 = vmatpush.bf16.msrb.mxu1 %v1833_v32  ;;  %v2089_v45 = vor.u32 %v2369_v42, %v2088_v41  ;;  %v2265_v46 = vld [vmem:[#allocation4 + $0xac] sm:$0xf0]  ;;  %1588 = vmatmul.msk.bf16.vlgmr.msra.gmra.mxu2 %vm113_vm0, %v64_v27 }
  0x15   :  { %v1800_v47 = vld [vmem:[#allocation4 + $0x1a0] sm:$0xf]  ;;  %v2297_v48 = vld [vmem:[#allocation4 + $0x1ac] sm:$0xf0]  ;;  %1589 = vmatmul.msk.bf16.vlgmr.msra.gmra.mxu3 %vm113_vm0, %v64_v27  ;;  %1010 = vmatpush.bf16.msrb.mxu2 %v1961_v40  ;;  %v1673_v54 = vor.u32 %v2265_v46, %v1672_v43 }
  0x16   :  { %v1944_v49 = vld [vmem:[#allocation4 + $0x2c0] sm:$0xf]  ;;  %v2333_v50 = vld [vmem:[#allocation4 + $0x2cc] sm:$0xf0]  ;;  %1023 = vmatpush.bf16.msrb.mxu3 %v2089_v45  ;;  %v1801_v59 = vor.u32 %v2297_v48, %v1800_v47 }
  0x17   :  { %v2072_v51 = vld [vmem:[#allocation4 + $0x3c0] sm:$0xf]  ;;  %v1945_v52 = vor.u32 %v2333_v50, %v1944_v49  ;;  %v2365_v53 = vld [vmem:[#allocation4 + $0x3cc] sm:$0xf0]  ;;  %985 = vmatpush.bf16.msrb.mxu0 %v1689_v39  ;;  %v2271_v49 = vld [vmem:[#allocation4 + $0xe4] sm:$0xf] }
  0x18   :  { %v2073_v55 = vor.u32 %v2365_v53, %v2072_v51  ;;  %v1656_v56 = vld [vmem:[#allocation4 + $0x80] sm:$0xf]  ;;  %v2261_v57 = vld [vmem:[#allocation4 + $0x8c] sm:$0xf0]  ;;  %998 = vmatpush.bf16.msrb.mxu1 %v1817_v44  ;;  %v1706_v50 = vld [vmem:[#allocation4 + $0xf0] sm:$0xf0] }
  0x19   :  { %v1928_v58 = vld [vmem:[#allocation4 + $0x2a0] sm:$0xf]  ;;  %v2329_v60 = vld [vmem:[#allocation4 + $0x2ac] sm:$0xf0]  ;;  %1011 = vmatpush.bf16.msrb.mxu2 %v1945_v52  ;;  %v1657_v2 = vor.u32 %v2261_v57, %v1656_v56  ;;  %v2303_v51 = vld [vmem:[#allocation4 + $0x1e4] sm:$0xf] }
  0x1a   :  { %v2056_v61 = vld [vmem:[#allocation4 + $0x3a0] sm:$0xf]  ;;  %v2361_v62 = vld [vmem:[#allocation4 + $0x3ac] sm:$0xf0]  ;;  %v1929_v1 = vor.u32 %v2329_v60, %v1928_v58  ;;  %1024 = vmatpush.bf16.msrb.mxu3 %v2073_v55  ;;  %v1834_v52 = vld [vmem:[#allocation4 + $0x1f0] sm:$0xf0] }
  0x1b   :  { %v1784_v63 = vld [vmem:[#allocation4 + $0x180] sm:$0xf]  ;;  %v2293_v0 = vld [vmem:[#allocation4 + $0x18c] sm:$0xf0]  ;;  %986 = vmatpush.bf16.msrb.mxu0 %v1673_v54  ;;  %v2057_v3 = vor.u32 %v2361_v62, %v2056_v61  ;;  %v2267_v56 = vld [vmem:[#allocation4 + $0xc4] sm:$0xf]  ;;  %v1709_v61 = vor.u32 %v2271_v49, %v1706_v50 }
  0x1c   :  { %v1640_v4 = vld [vmem:[#allocation4 + $0x60] sm:$0xf]  ;;  %v2325_v6 = vld [vmem:[#allocation4 + $0x28c] sm:$0xf0]  ;;  %999 = vmatpush.bf16.msrb.mxu1 %v1801_v59  ;;  %v1785_v7 = vor.u32 %v2293_v0, %v1784_v63  ;;  %v2335_v63 = vld [vmem:[#allocation4 + $0x2e4] sm:$0xf] }
  0x1d   :  { %v1912_v5 = vld [vmem:[#allocation4 + $0x280] sm:$0xf]  ;;  %v2257_v8 = vld [vmem:[#allocation4 + $0x6c] sm:$0xf0]  ;;  %1012 = vmatpush.bf16.msrb.mxu2 %v1929_v1  ;;  %v1962_v0 = vld [vmem:[#allocation4 + $0x2f0] sm:$0xf0]  ;;  %v1837_v1 = vor.u32 %v2303_v51, %v1834_v52 }
  0x1e   :  { %v2040_v9 = vld [vmem:[#allocation4 + $0x380] sm:$0xf]  ;;  %v2357_v10 = vld [vmem:[#allocation4 + $0x38c] sm:$0xf0]  ;;  %v1913_v13 = vor.u32 %v2325_v6, %v1912_v5  ;;  %1025 = vmatpush.bf16.msrb.mxu3 %v2057_v3  ;;  %v1641_v14 = vor.u32 %v2257_v8, %v1640_v4  ;;  %v2367_v3 = vld [vmem:[#allocation4 + $0x3e4] sm:$0xf] }
  0x1f   :  { %v1768_v11 = vld [vmem:[#allocation4 + $0x160] sm:$0xf]  ;;  %v2289_v12 = vld [vmem:[#allocation4 + $0x16c] sm:$0xf0]  ;;  %987 = vmatpush.bf16.msrb.mxu0 %v1657_v2  ;;  %v2041_v15 = vor.u32 %v2357_v10, %v2040_v9  ;;  %v1690_v2 = vld [vmem:[#allocation4 + $0xd0] sm:$0xf0]  ;;  %v1965_v9 = vor.u32 %v2335_v63, %v1962_v0 }
  0x20   :  { %v1624_v16 = vld [vmem:[#allocation4 + $0x40] sm:$0xf]  ;;  %v2321_v18 = vld [vmem:[#allocation4 + $0x26c] sm:$0xf0]  ;;  %1000 = vmatpush.bf16.msrb.mxu1 %v1785_v7  ;;  %v1769_v19 = vor.u32 %v2289_v12, %v1768_v11  ;;  %v2090_v4 = vld [vmem:[#allocation4 + $0x3f0] sm:$0xf0]  ;;  %v1693_v11 = vor.u32 %v2267_v56, %v1690_v2 }
  0x21   :  { %v1896_v17 = vld [vmem:[#allocation4 + $0x260] sm:$0xf]  ;;  %v2253_v20 = vld [vmem:[#allocation4 + $0x4c] sm:$0xf0]  ;;  %1013 = vmatpush.bf16.msrb.mxu2 %v1913_v13  ;;  %v2299_v5 = vld [vmem:[#allocation4 + $0x1c4] sm:$0xf]  ;;  %v2093_v12 = vor.u32 %v2367_v3, %v2090_v4 }
  0x22   :  { %v2024_v21 = vld [vmem:[#allocation4 + $0x360] sm:$0xf]  ;;  %v2353_v22 = vld [vmem:[#allocation4 + $0x36c] sm:$0xf0]  ;;  %v1897_v25 = vor.u32 %v2321_v18, %v1896_v17  ;;  %1026 = vmatpush.bf16.msrb.mxu3 %v2041_v15  ;;  %v1625_v26 = vor.u32 %v2253_v20, %v1624_v16  ;;  %v1818_v6 = vld [vmem:[#allocation4 + $0x1d0] sm:$0xf0] }
  0x23   :  { %v1752_v23 = vld [vmem:[#allocation4 + $0x140] sm:$0xf]  ;;  %v2285_v24 = vld [vmem:[#allocation4 + $0x14c] sm:$0xf0]  ;;  %988 = vmatpush.bf16.msrb.mxu0 %v1641_v14  ;;  %v2025_v27 = vor.u32 %v2353_v22, %v2024_v21  ;;  %v2263_v10 = vld [vmem:[#allocation4 + $0xa4] sm:$0xf]  ;;  %v1821_v16 = vor.u32 %v2299_v5, %v1818_v6 }
  0x24   :  { %v1608_v28 = vld [vmem:[#allocation4 + $0x20] sm:$0xf]  ;;  %v2317_v30 = vld [vmem:[#allocation4 + $0x24c] sm:$0xf0]  ;;  %1001 = vmatpush.bf16.msrb.mxu1 %v1769_v19  ;;  %v1753_v31 = vor.u32 %v2285_v24, %v1752_v23  ;;  %v1674_v13 = vld [vmem:[#allocation4 + $0xb0] sm:$0xf0] }
  0x25   :  { %v1880_v29 = vld [vmem:[#allocation4 + $0x240] sm:$0xf]  ;;  %v2249_v32 = vld [vmem:[#allocation4 + $0x2c] sm:$0xf0]  ;;  %1014 = vmatpush.bf16.msrb.mxu2 %v1897_v25  ;;  %v2331_v14 = vld [vmem:[#allocation4 + $0x2c4] sm:$0xf]  ;;  %v1677_v22 = vor.u32 %v2263_v10, %v1674_v13 }
  0x26   :  { %v2008_v33 = vld [vmem:[#allocation4 + $0x340] sm:$0xf]  ;;  %v2349_v34 = vld [vmem:[#allocation4 + $0x34c] sm:$0xf0]  ;;  %v1881_v37 = vor.u32 %v2317_v30, %v1880_v29  ;;  %1027 = vmatpush.bf16.msrb.mxu3 %v2025_v27  ;;  %v1609_v39 = vor.u32 %v2249_v32, %v1608_v28  ;;  %v1946_v15 = vld [vmem:[#allocation4 + $0x2d0] sm:$0xf0] }
  0x27   :  { %v1736_v35 = vld [vmem:[#allocation4 + $0x120] sm:$0xf]  ;;  %v2281_v36 = vld [vmem:[#allocation4 + $0x12c] sm:$0xf0]  ;;  %989 = vmatpush.bf16.msrb.mxu0 %v1625_v26  ;;  %v2009_v40 = vor.u32 %v2349_v34, %v2008_v33  ;;  %v2295_v17 = vld [vmem:[#allocation4 + $0x1a4] sm:$0xf]  ;;  %v1949_v21 = vor.u32 %v2331_v14, %v1946_v15 }
  0x28   :  { %v1592_v38 = vld [vmem:[#allocation4] sm:$0xf]  ;;  %v2245_v41 = vld [vmem:[#allocation4 + $0xc] sm:$0xf0]  ;;  %1002 = vmatpush.bf16.msrb.mxu1 %v1753_v31  ;;  %v1737_v44 = vor.u32 %v2281_v36, %v1736_v35  ;;  %v2363_v18 = vld [vmem:[#allocation4 + $0x3c4] sm:$0xf] }
  0x29   :  { %v1864_v42 = vld [vmem:[#allocation4 + $0x220] sm:$0xf]  ;;  %v2313_v43 = vld [vmem:[#allocation4 + $0x22c] sm:$0xf0]  ;;  %1015 = vmatpush.bf16.msrb.mxu2 %v1881_v37  ;;  %v1593_v54 = vor.u32 %v2245_v41, %v1592_v38  ;;  %v2074_v19 = vld [vmem:[#allocation4 + $0x3d0] sm:$0xf0] }
  0x2a   :  { %v1720_v45 = vld [vmem:[#allocation4 + $0x100] sm:$0xf]  ;;  %v2345_v47 = vld [vmem:[#allocation4 + $0x32c] sm:$0xf0]  ;;  %v1865_v53 = vor.u32 %v2313_v43, %v1864_v42  ;;  %1028 = vmatpush.bf16.msrb.mxu3 %v2009_v40  ;;  %v1802_v20 = vld [vmem:[#allocation4 + $0x1b0] sm:$0xf0]  ;;  %v2077_v23 = vor.u32 %v2363_v18, %v2074_v19 }
  0x2b   :  { %v1992_v46 = vld [vmem:[#allocation4 + $0x320] sm:$0xf]  ;;  %v2277_v48 = vld [vmem:[#allocation4 + $0x10c] sm:$0xf0]  ;;  %990 = vmatpush.bf16.msrb.mxu0 %v1609_v39  ;;  %v2259_v24 = vld [vmem:[#allocation4 + $0x84] sm:$0xf]  ;;  %v1805_v27 = vor.u32 %v2295_v17, %v1802_v20 }
  0x2c   :  { %v1993_v55 = vor.u32 %v2345_v47, %v1992_v46  ;;  %v1848_v57 = vld [vmem:[#allocation4 + $0x200] sm:$0xf]  ;;  %v2309_v58 = vld [vmem:[#allocation4 + $0x20c] sm:$0xf0]  ;;  %1003 = vmatpush.bf16.msrb.mxu1 %v1737_v44  ;;  %v1721_v60 = vor.u32 %v2277_v48, %v1720_v45  ;;  %v2327_v25 = vld [vmem:[#allocation4 + $0x2a4] sm:$0xf] }
  0x2d   :  { %v1976_v59 = vld [vmem:[#allocation4 + $0x300] sm:$0xf]  ;;  %v2341_v62 = vld [vmem:[#allocation4 + $0x30c] sm:$0xf0]  ;;  %1016 = vmatpush.bf16.msrb.mxu2 %v1865_v53  ;;  %v1849_v7 = vor.u32 %v2309_v58, %v1848_v57  ;;  %v1930_v26 = vld [vmem:[#allocation4 + $0x2b0] sm:$0xf0] }
  0x2e   :  { %1029 = vmatpush.bf16.msrb.mxu3 %v1993_v55  ;;  %v1977_v8 = vor.u32 %v2341_v62, %v1976_v59  ;;  %v1658_v28 = vld [vmem:[#allocation4 + $0x90] sm:$0xf0]  ;;  %v2359_v29 = vld [vmem:[#allocation4 + $0x3a4] sm:$0xf]  ;;  %v1933_v33 = vor.u32 %v2327_v25, %v1930_v26 }
  0x2f   :  { %991 = vmatpush.bf16.msrb.mxu0 %v1593_v54  ;;  %v2058_v30 = vld [vmem:[#allocation4 + $0x3b0] sm:$0xf0]  ;;  %v2291_v31 = vld [vmem:[#allocation4 + $0x184] sm:$0xf]  ;;  %v1661_v34 = vor.u32 %v2259_v24, %v1658_v28 }
  0x30   :  { %1004 = vmatpush.bf16.msrb.mxu1 %v1721_v60  ;;  %v1786_v32 = vld [vmem:[#allocation4 + $0x190] sm:$0xf0]  ;;  %v2061_v35 = vor.u32 %v2359_v29, %v2058_v30  ;;  %v2255_v36 = vld [vmem:[#allocation4 + $0x64] sm:$0xf] }
  0x31   :  { %1017 = vmatpush.bf16.msrb.mxu2 %v1849_v7  ;;  %v2323_v37 = vld [vmem:[#allocation4 + $0x284] sm:$0xf]  ;;  %v1914_v38 = vld [vmem:[#allocation4 + $0x290] sm:$0xf0]  ;;  %v1789_v39 = vor.u32 %v2291_v31, %v1786_v32 }
  0x32   :  { %1030 = vmatpush.bf16.msrb.mxu3 %v1977_v8  ;;  %v1642_v40 = vld [vmem:[#allocation4 + $0x70] sm:$0xf0]  ;;  %v2355_v41 = vld [vmem:[#allocation4 + $0x384] sm:$0xf]  ;;  %v1917_v45 = vor.u32 %v2323_v37, %v1914_v38  ;;  %v2306_v37 = vld [vmem:[#allocation4 + $0x1f4] sm:$0xf0] }
  0x33   :  { %1036 = vmatpush.bf16.msra.mxu0 %v1709_v61  ;;  %v2042_v42 = vld [vmem:[#allocation4 + $0x390] sm:$0xf0]  ;;  %v2287_v43 = vld [vmem:[#allocation4 + $0x164] sm:$0xf]  ;;  %v1645_v46 = vor.u32 %v2255_v36, %v1642_v40  ;;  %v1840_v36 = vld [vmem:[#allocation4 + $0x1e8] sm:$0xf] }
  0x34   :  { %1049 = vmatpush.bf16.msra.mxu1 %v1837_v1  ;;  %v1770_v44 = vld [vmem:[#allocation4 + $0x170] sm:$0xf0]  ;;  %v2045_v47 = vor.u32 %v2355_v41, %v2042_v42  ;;  %v2251_v49 = vld [vmem:[#allocation4 + $0x44] sm:$0xf] }
  0x35   :  { %1062 = vmatpush.bf16.msra.mxu2 %v1965_v9  ;;  %v1773_v48 = vor.u32 %v2287_v43, %v1770_v44  ;;  %v1626_v50 = vld [vmem:[#allocation4 + $0x50] sm:$0xf0]  ;;  %v2283_v51 = vld [vmem:[#allocation4 + $0x144] sm:$0xf]  ;;  %v1841_v44 = vor.u32 %v2306_v37, %v1840_v36 }
  0x36   :  { %1075 = vmatpush.bf16.msra.mxu3 %v2093_v12  ;;  %v1754_v52 = vld [vmem:[#allocation4 + $0x150] sm:$0xf0]  ;;  %v1629_v53 = vor.u32 %v2251_v49, %v1626_v50  ;;  %v2319_v55 = vld [vmem:[#allocation4 + $0x264] sm:$0xf]  ;;  %v2302_v49 = vld [vmem:[#allocation4 + $0x1d4] sm:$0xf0] }
  0x37   :  { %1037 = vmatpush.bf16.msra.mxu0 %v1693_v11  ;;  %v1757_v54 = vor.u32 %v2283_v51, %v1754_v52  ;;  %v1898_v56 = vld [vmem:[#allocation4 + $0x270] sm:$0xf0]  ;;  %v2351_v57 = vld [vmem:[#allocation4 + $0x364] sm:$0xf] }
  0x38   :  { %1050 = vmatpush.bf16.msra.mxu1 %v1821_v16  ;;  %v1901_v58 = vor.u32 %v2319_v55, %v1898_v56  ;;  %v2026_v59 = vld [vmem:[#allocation4 + $0x370] sm:$0xf0]  ;;  %v2247_v61 = vld [vmem:[#allocation4 + $0x24] sm:$0xf]  ;;  %v1968_v55 = vld [vmem:[#allocation4 + $0x2e8] sm:$0xf] }
  0x39   :  { %1063 = vmatpush.bf16.msra.mxu2 %v1949_v21  ;;  %v2029_v60 = vor.u32 %v2351_v57, %v2026_v59  ;;  %v1610_v62 = vld [vmem:[#allocation4 + $0x30] sm:$0xf0]  ;;  %v2279_v0 = vld [vmem:[#allocation4 + $0x124] sm:$0xf]  ;;  %v2338_v56 = vld [vmem:[#allocation4 + $0x2f4] sm:$0xf0] }
  0x3a   :  { %1076 = vmatpush.bf16.msra.mxu3 %v2077_v23  ;;  %v1613_v63 = vor.u32 %v2247_v61, %v1610_v62  ;;  %v1738_v1 = vld [vmem:[#allocation4 + $0x130] sm:$0xf0]  ;;  %v2315_v3 = vld [vmem:[#allocation4 + $0x244] sm:$0xf]  ;;  %v2096_v57 = vld [vmem:[#allocation4 + $0x3e8] sm:$0xf] }
  0x3b   :  { %1038 = vmatpush.bf16.msra.mxu0 %v1677_v22  ;;  %v1741_v2 = vor.u32 %v2279_v0, %v1738_v1  ;;  %v1882_v4 = vld [vmem:[#allocation4 + $0x250] sm:$0xf0]  ;;  %v2347_v5 = vld [vmem:[#allocation4 + $0x344] sm:$0xf]  ;;  %v2370_v61 = vld [vmem:[#allocation4 + $0x3f4] sm:$0xf0] }
  0x3c   :  { %1051 = vmatpush.bf16.msra.mxu1 %v1805_v27  ;;  %v1885_v6 = vor.u32 %v2315_v3, %v1882_v4  ;;  %v2010_v7 = vld [vmem:[#allocation4 + $0x350] sm:$0xf0]  ;;  %v2243_v9 = vld [vmem:[#allocation4 + $0x4] sm:$0xf]  ;;  %v184_v27 = vld [vmem:[%s2702_s2] sm:$0xf]  ;;  %v1969_v4 = vor.u32 %v2338_v56, %v1968_v55 }
  0x3d   :  { %1064 = vmatpush.bf16.msra.mxu2 %v1933_v33  ;;  %v2013_v8 = vor.u32 %v2347_v5, %v2010_v7  ;;  %v1594_v10 = vld [vmem:[#allocation4 + $0x10] sm:$0xf0]  ;;  %v2275_v11 = vld [vmem:[#allocation4 + $0x104] sm:$0xf]  ;;  %v186_v28 = vperm.slane %v184_v27, 0  ;;  %v187_v29 = vperm.slane %v184_v27, 1 }
  0x3e   :  { %1077 = vmatpush.bf16.msra.mxu3 %v2061_v35  ;;  %v1597_v12 = vor.u32 %v2243_v9, %v1594_v10  ;;  %v1722_v13 = vld [vmem:[#allocation4 + $0x110] sm:$0xf0]  ;;  %v2311_v15 = vld [vmem:[#allocation4 + $0x224] sm:$0xf]  ;;  %v1712_v33 = vld [vmem:[#allocation4 + $0xe8] sm:$0xf] }
  0x3f   :  { %1039 = vmatpush.bf16.msra.mxu0 %v1661_v34  ;;  %v1725_v14 = vor.u32 %v2275_v11, %v1722_v13  ;;  %v1866_v16 = vld [vmem:[#allocation4 + $0x230] sm:$0xf0]  ;;  %v2343_v17 = vld [vmem:[#allocation4 + $0x324] sm:$0xf]  ;;  %v2274_v34 = vld [vmem:[#allocation4 + $0xf4] sm:$0xf0] }
  0x40   :  { %1052 = vmatpush.bf16.msra.mxu1 %v1789_v39  ;;  %v1869_v18 = vor.u32 %v2311_v15, %v1866_v16  ;;  %v1994_v19 = vld [vmem:[#allocation4 + $0x330] sm:$0xf0]  ;;  %v2307_v21 = vld [vmem:[#allocation4 + $0x204] sm:$0xf]  ;;  %v188_v40 = vperm.slane %v184_v27, 2  ;;  %v1713_v41 = vor.u32 %v2274_v34, %v1712_v33  ;;  %v189_v43 = vperm.slane %v184_v27, 3 }
  0x41   :  { %1065 = vmatpush.bf16.msra.mxu2 %v1917_v45  ;;  %v1997_v20 = vor.u32 %v2343_v17, %v1994_v19  ;;  %v1850_v22 = vld [vmem:[#allocation4 + $0x210] sm:$0xf0]  ;;  %v2339_v24 = vld [vmem:[#allocation4 + $0x304] sm:$0xf]  ;;  %v1696_v45 = vld [vmem:[#allocation4 + $0xc8] sm:$0xf] }
  0x42   :  { %1078 = vmatpush.bf16.msra.mxu3 %v2045_v47  ;;  %v1853_v23 = vor.u32 %v2307_v21, %v1850_v22  ;;  %v1978_v25 = vld [vmem:[#allocation4 + $0x310] sm:$0xf0]  ;;  %v1680_v62 = vld [vmem:[#allocation4 + $0xa8] sm:$0xf]  ;;  %v2334_v9 = vld [vmem:[#allocation4 + $0x2d4] sm:$0xf0] }
  0x43   :  { %1040 = vmatpush.bf16.msra.mxu0 %v1645_v46  ;;  %v1981_v26 = vor.u32 %v2339_v24, %v1978_v25  ;;  %v2270_v46 = vld [vmem:[#allocation4 + $0xd4] sm:$0xf0]  ;;  %v1808_v1 = vld [vmem:[#allocation4 + $0x1a8] sm:$0xf] }
  0x44   :  { %1053 = vmatpush.bf16.msra.mxu1 %v1773_v48  ;;  %v1824_v48 = vld [vmem:[#allocation4 + $0x1c8] sm:$0xf]  ;;  %v2366_v13 = vld [vmem:[#allocation4 + $0x3d4] sm:$0xf0] }
  0x45   :  { %1066 = vmatpush.bf16.msra.mxu2 %v1901_v58  ;;  %v2080_v10 = vld [vmem:[#allocation4 + $0x3c8] sm:$0xf]  ;;  %v2262_v15 = vld [vmem:[#allocation4 + $0x94] sm:$0xf0] }
  0x46   :  { %1079 = vmatpush.bf16.msra.mxu3 %v2029_v60  ;;  %v1825_v60 = vor.u32 %v2302_v49, %v1824_v48  ;;  %v1792_v16 = vld [vmem:[#allocation4 + $0x188] sm:$0xf]  ;;  %v2294_v17 = vld [vmem:[#allocation4 + $0x194] sm:$0xf0]  ;;  %v2081_v21 = vor.u32 %v2366_v13, %v2080_v10  ;;  %v2304_v10 = vld [vmem:[#allocation4 + $0x1ec] sm:$0xf] }
  0x47   :  { %1041 = vmatpush.bf16.msra.mxu0 %v1629_v53  ;;  %v2330_v24 = vld [vmem:[#allocation4 + $0x2b4] sm:$0xf0]  ;;  %v1793_v25 = vor.u32 %v2294_v17, %v1792_v16  ;;  %v1920_v34 = vld [vmem:[#allocation4 + $0x288] sm:$0xf] }
  0x48   :  { %1054 = vmatpush.bf16.msra.mxu1 %v1757_v54  ;;  %v1697_v54 = vor.u32 %v2270_v46, %v1696_v45  ;;  %v2362_v27 = vld [vmem:[#allocation4 + $0x3b4] sm:$0xf0]  ;;  %v1904_v48 = vld [vmem:[#allocation4 + $0x268] sm:$0xf] }
  0x49   :  { %1067 = vmatpush.bf16.msra.mxu2 %v1885_v6  ;;  %v2097_v6 = vor.u32 %v2370_v61, %v2096_v57  ;;  %v2322_v49 = vld [vmem:[#allocation4 + $0x274] sm:$0xf0]  ;;  %v1744_v56 = vld [vmem:[#allocation4 + $0x128] sm:$0xf] }
  0x4a   :  { %1080 = vmatpush.bf16.msra.mxu3 %v2013_v8  ;;  %v1952_v8 = vld [vmem:[#allocation4 + $0x2c8] sm:$0xf]  ;;  %v2250_v55 = vld [vmem:[#allocation4 + $0x34] sm:$0xf0] }
  0x4b   :  { %1042 = vmatpush.bf16.msra.mxu0 %v1613_v63  ;;  %v2266_v63 = vld [vmem:[#allocation4 + $0xb4] sm:$0xf0]  ;;  %v1953_v19 = vor.u32 %v2334_v9, %v1952_v8  ;;  %v1714_v9 = vld [vmem:[#allocation4 + $0xf8] sm:$0xf0] }
  0x4c   :  { %1055 = vmatpush.bf16.msra.mxu1 %v1741_v2  ;;  %v2298_v2 = vld [vmem:[#allocation4 + $0x1b4] sm:$0xf0]  ;;  %v1681_v7 = vor.u32 %v2266_v63, %v1680_v62  ;;  %v2016_v62 = vld [vmem:[#allocation4 + $0x348] sm:$0xf] }
  0x4d   :  { %1068 = vmatpush.bf16.msra.mxu2 %v1869_v18  ;;  %v2282_v57 = vld [vmem:[#allocation4 + $0x134] sm:$0xf0] }
  0x4e   :  { %1081 = vmatpush.bf16.msra.mxu3 %v1997_v20  ;;  %v2318_v61 = vld [vmem:[#allocation4 + $0x254] sm:$0xf0] }
  0x4f   :  { %1043 = vmatpush.bf16.msra.mxu0 %v1597_v12  ;;  %v1809_v12 = vor.u32 %v2298_v2, %v1808_v1  ;;  %v2350_v1 = vld [vmem:[#allocation4 + $0x354] sm:$0xf0]  ;;  %v1600_v2 = vld [vmem:[#allocation4 + $0x8] sm:$0xf] }
  0x50   :  { %1056 = vmatpush.bf16.msra.mxu1 %v1725_v14  ;;  %v1664_v14 = vld [vmem:[#allocation4 + $0x88] sm:$0xf]  ;;  %v2017_v13 = vor.u32 %v2350_v1, %v2016_v62  ;;  %v2066_v1 = vld [vmem:[#allocation4 + $0x3b8] sm:$0xf0] }
  0x51   :  { %1069 = vmatpush.bf16.msra.mxu2 %v1853_v23  ;;  %v1665_v22 = vor.u32 %v2262_v15, %v1664_v14  ;;  %v1936_v23 = vld [vmem:[#allocation4 + $0x2a8] sm:$0xf]  ;;  %v2314_v15 = vld [vmem:[#allocation4 + $0x234] sm:$0xf0] }
  0x52   :  { %1082 = vmatpush.bf16.msra.mxu3 %v1981_v26  ;;  %v2064_v26 = vld [vmem:[#allocation4 + $0x3a8] sm:$0xf] }
  0x53   :  { %v2065_v33 = vor.u32 %v2362_v27, %v2064_v26  ;;  %v1872_v14 = vld [vmem:[#allocation4 + $0x228] sm:$0xf]  ;;  %v1826_v26 = vld [vmem:[#allocation4 + $0x1d8] sm:$0xf0] }
  0x8f   :  { %v126_v30 = vpop.f32.mrf.mxu0 }
  0x90   :  { %v194_v31 = vadd.f32 %v186_v28, %v126_v30  ;;  %v139_v32 = vpop.f32.mrf.mxu1  ;;  %v1648_v28 = vld [vmem:[#allocation4 + $0x68] sm:$0xf] }
  0x91   :  { %v195_v35 = vadd.f32 %v187_v29, %v139_v32  ;;  %v2258_v29 = vld [vmem:[#allocation4 + $0x74] sm:$0xf0]  ;;  %v1776_v30 = vld [vmem:[#allocation4 + $0x168] sm:$0xf]  ;;  %v1937_v32 = vor.u32 %v2330_v24, %v1936_v23  ;;  %v1873_v23 = vor.u32 %v2314_v15, %v1872_v14  ;;  %v1698_v24 = vld [vmem:[#allocation4 + $0xd8] sm:$0xf0] }
  0x92   :  { %v198_v38 = vmax.f32 %v194_v31, 0.0  ;;  %v2290_v31 = vld [vmem:[#allocation4 + $0x174] sm:$0xf0]  ;;  %v1649_v36 = vor.u32 %v2258_v29, %v1648_v28  ;;  %v1856_v28 = vld [vmem:[#allocation4 + $0x208] sm:$0xf] }
  0x93   :  { %v199_v39 = vmax.f32 %v195_v35, 0.0  ;;  %v2326_v35 = vld [vmem:[#allocation4 + $0x294] sm:$0xf0]  ;;  %v1777_v37 = vor.u32 %v2290_v31, %v1776_v30  ;;  %v1984_v30 = vld [vmem:[#allocation4 + $0x308] sm:$0xf] }
  0x94   :  { %v2562_v42 = vpack.c.bf16 %v198_v38, %v198_v38  ;;  %v2048_v38 = vld [vmem:[#allocation4 + $0x388] sm:$0xf]  ;;  %v1921_v45 = vor.u32 %v2326_v35, %v1920_v34  ;;  %v2310_v29 = vld [vmem:[#allocation4 + $0x214] sm:$0xf0]  ;;  %v2356_v14 = vld [vmem:[#allocation4 + $0x38c] sm:$0xf] }
  0x95   :  { %v2564_v47 = vpack.c.bf16 %v199_v39, %v199_v39  ;;  %v2358_v39 = vld [vmem:[#allocation4 + $0x394] sm:$0xf0]  ;;  %v2050_v15 = vld [vmem:[#allocation4 + $0x398] sm:$0xf0] }
  0x96   :  { %992 = vmatmul.bf16.vlgmr.msrb.gmra.mxu0 %v2562_v42  ;;  %v2049_v46 = vor.u32 %v2358_v39, %v2048_v38  ;;  %v2342_v31 = vld [vmem:[#allocation4 + $0x314] sm:$0xf0]  ;;  %v2264_v38 = vld [vmem:[#allocation4 + $0xac] sm:$0xf]  ;;  %v1857_v39 = vor.u32 %v2310_v29, %v1856_v28  ;;  %v1618_v29 = vld [vmem:[#allocation4 + $0x38] sm:$0xf0] }
  0x97   :  { %v152_v50 = vpop.f32.mrf.mxu2  ;;  %1005 = vmatmul.bf16.vlgmr.msrb.gmra.mxu1 %v2564_v47  ;;  %1088 = vmatpush.bf16.msrb.mxu0 %v1713_v41  ;;  %v128_v53 = vpop.f32.mrf.mxu0  ;;  %v2254_v41 = vld [vmem:[#allocation4 + $0x54] sm:$0xf0]  ;;  %v2248_v28 = vld [vmem:[#allocation4 + $0x2c] sm:$0xf] }
  0x98   :  { %v196_v51 = vadd.f32 %v188_v40, %v152_v50  ;;  %v165_v52 = vpop.f32.mrf.mxu3  ;;  %1101 = vmatpush.bf16.msrb.mxu1 %v1841_v44  ;;  %v141_v59 = vpop.f32.mrf.mxu1  ;;  %v1632_v40 = vld [vmem:[#allocation4 + $0x48] sm:$0xf]  ;;  %v2286_v44 = vld [vmem:[#allocation4 + $0x154] sm:$0xf0] }
  0x99   :  { %v197_v58 = vadd.f32 %v189_v43, %v165_v52  ;;  %v1760_v43 = vld [vmem:[#allocation4 + $0x148] sm:$0xf]  ;;  %v1633_v50 = vor.u32 %v2254_v41, %v1632_v40  ;;  %v2354_v53 = vld [vmem:[#allocation4 + $0x374] sm:$0xf0]  ;;  %v1682_v40 = vld [vmem:[#allocation4 + $0xb8] sm:$0xf0] }
  0x9a   :  { %v200_v0 = vmax.f32 %v196_v51, 0.0  ;;  %v1761_v51 = vor.u32 %v2286_v44, %v1760_v43  ;;  %v2032_v52 = vld [vmem:[#allocation4 + $0x368] sm:$0xf]  ;;  %v2296_v41 = vld [vmem:[#allocation4 + $0x1ac] sm:$0xf]  ;;  %v1985_v44 = vor.u32 %v2342_v31, %v1984_v30 }
  0x9b   :  { %v201_v3 = vmax.f32 %v197_v58, 0.0  ;;  %1089 = vmatpush.bf16.msrb.mxu0 %v1697_v54  ;;  %v1616_v54 = vld [vmem:[#allocation4 + $0x28] sm:$0xf]  ;;  %v1905_v58 = vor.u32 %v2322_v49, %v1904_v48  ;;  %v2033_v59 = vor.u32 %v2354_v53, %v2032_v52  ;;  %v1810_v43 = vld [vmem:[#allocation4 + $0x1b8] sm:$0xf0] }
  0x9c   :  { %v2568_v5 = vpack.c.bf16 %v200_v0, %v200_v0  ;;  %1102 = vmatpush.bf16.msrb.mxu1 %v1825_v60  ;;  %v1888_v60 = vld [vmem:[#allocation4 + $0x248] sm:$0xf]  ;;  %v1617_v63 = vor.u32 %v2250_v55, %v1616_v54  ;;  %v1745_v0 = vor.u32 %v2282_v57, %v1744_v56  ;;  %v2332_v48 = vld [vmem:[#allocation4 + $0x2cc] sm:$0xf]  ;;  %v1954_v49 = vld [vmem:[#allocation4 + $0x2d8] sm:$0xf0] }
  0x9d   :  { %v2570_v11 = vpack.c.bf16 %v201_v3, %v201_v3  ;;  %v2246_v3 = vld [vmem:[#allocation4 + $0x14] sm:$0xf0]  ;;  %v1889_v8 = vor.u32 %v2318_v61, %v1888_v60  ;;  %v2364_v52 = vld [vmem:[#allocation4 + $0x3cc] sm:$0xf]  ;;  %v2082_v53 = vld [vmem:[#allocation4 + $0x3d8] sm:$0xf0] }
  0x9e   :  { %1018 = vmatmul.bf16.vlgmr.msrb.gmra.mxu2 %v2568_v5  ;;  %v1601_v16 = vor.u32 %v2246_v3, %v1600_v2  ;;  %v2260_v54 = vld [vmem:[#allocation4 + $0x8c] sm:$0xf]  ;;  %v1666_v55 = vld [vmem:[#allocation4 + $0x98] sm:$0xf0] }
  0x9f   :  { %1031 = vmatmul.bf16.vlgmr.msrb.gmra.mxu3 %v2570_v11  ;;  %1114 = vmatpush.bf16.msrb.mxu2 %v1969_v4  ;;  %v154_v18 = vpop.f32.mrf.mxu2  ;;  %v1728_v4 = vld [vmem:[#allocation4 + $0x108] sm:$0xf]  ;;  %v2292_v56 = vld [vmem:[#allocation4 + $0x18c] sm:$0xf]  ;;  %v1794_v57 = vld [vmem:[#allocation4 + $0x198] sm:$0xf0]  ;;  %v1669_v62 = vor.u32 %v2260_v54, %v1666_v55 }
  0xa0   :  { %1127 = vmatpush.bf16.msrb.mxu3 %v2097_v6  ;;  %v167_v20 = vpop.f32.mrf.mxu3  ;;  %1090 = vmatpush.bf16.msrb.mxu0 %v1681_v7  ;;  %v2278_v6 = vld [vmem:[#allocation4 + $0x114] sm:$0xf0]  ;;  %v2272_v7 = vld [vmem:[#allocation4 + $0xec] sm:$0xf]  ;;  %v2000_v18 = vld [vmem:[#allocation4 + $0x328] sm:$0xf] }
  0xa1   :  { %1103 = vmatpush.bf16.msrb.mxu1 %v1809_v12  ;;  %v1842_v12 = vld [vmem:[#allocation4 + $0x1f8] sm:$0xf0]  ;;  %v1729_v17 = vor.u32 %v2278_v6, %v1728_v4  ;;  %v1717_v20 = vor.u32 %v2272_v7, %v1714_v9  ;;  %v2328_v60 = vld [vmem:[#allocation4 + $0x2ac] sm:$0xf] }
  0xa2   :  { %v1938_v61 = vld [vmem:[#allocation4 + $0x2b8] sm:$0xf0]  ;;  %v2256_v2 = vld [vmem:[#allocation4 + $0x6c] sm:$0xf] }
  0xa3   :  { %1115 = vmatpush.bf16.msrb.mxu2 %v1953_v19  ;;  %v2346_v19 = vld [vmem:[#allocation4 + $0x334] sm:$0xf0]  ;;  %v1650_v3 = vld [vmem:[#allocation4 + $0x78] sm:$0xf0]  ;;  %v2288_v4 = vld [vmem:[#allocation4 + $0x16c] sm:$0xf]  ;;  %v1941_v7 = vor.u32 %v2328_v60, %v1938_v61 }
  0xa4   :  { %1128 = vmatpush.bf16.msrb.mxu3 %v2081_v21  ;;  %1091 = vmatpush.bf16.msrb.mxu0 %v1665_v22  ;;  %v1845_v21 = vor.u32 %v2304_v10, %v1842_v12  ;;  %v2268_v22 = vld [vmem:[#allocation4 + $0xcc] sm:$0xf]  ;;  %v2001_v27 = vor.u32 %v2346_v19, %v2000_v18  ;;  %v1778_v6 = vld [vmem:[#allocation4 + $0x178] sm:$0xf0]  ;;  %v1653_v12 = vor.u32 %v2256_v2, %v1650_v3 }
  0xa5   :  { %1104 = vmatpush.bf16.msrb.mxu1 %v1793_v25  ;;  %v2300_v25 = vld [vmem:[#allocation4 + $0x1cc] sm:$0xf]  ;;  %v1701_v34 = vor.u32 %v2268_v22, %v1698_v24  ;;  %v1922_v10 = vld [vmem:[#allocation4 + $0x298] sm:$0xf0] }
  0xa6   :  { %1044 = vmatmul.bf16.vlgmr.msra.gmra.mxu0 %v2562_v42  ;;  %v1829_v35 = vor.u32 %v2300_v25, %v1826_v26  ;;  %v2324_v9 = vld [vmem:[#allocation4 + $0x28c] sm:$0xf]  ;;  %v1762_v19 = vld [vmem:[#allocation4 + $0x158] sm:$0xf0] }
  0xa7   :  { %1116 = vmatpush.bf16.msrb.mxu2 %v1937_v32  ;;  %1057 = vmatmul.bf16.vlgmr.msra.gmra.mxu1 %v2564_v47  ;;  %v2336_v32 = vld [vmem:[#allocation4 + $0x2ec] sm:$0xf]  ;;  %v1746_v31 = vld [vmem:[#allocation4 + $0x138] sm:$0xf0] }
  0xa8   :  { %1129 = vmatpush.bf16.msrb.mxu3 %v2065_v33  ;;  %1092 = vmatpush.bf16.msrb.mxu0 %v1649_v36  ;;  %v1970_v33 = vld [vmem:[#allocation4 + $0x2f8] sm:$0xf0]  ;;  %v2368_v36 = vld [vmem:[#allocation4 + $0x3ec] sm:$0xf] }
  0xa9   :  { %1105 = vmatpush.bf16.msrb.mxu1 %v1777_v37  ;;  %v2098_v37 = vld [vmem:[#allocation4 + $0x3f8] sm:$0xf0]  ;;  %v2284_v18 = vld [vmem:[#allocation4 + $0x14c] sm:$0xf] }
  0xaa   :  { %v2320_v22 = vld [vmem:[#allocation4 + $0x26c] sm:$0xf]  ;;  %v1765_v25 = vor.u32 %v2284_v18, %v1762_v19 }
  0xab   :  { %1117 = vmatpush.bf16.msrb.mxu2 %v1921_v45  ;;  %v1973_v45 = vor.u32 %v2336_v32, %v1970_v33  ;;  %v2352_v26 = vld [vmem:[#allocation4 + $0x36c] sm:$0xf] }
  0xac   :  { %1130 = vmatpush.bf16.msrb.mxu3 %v2049_v46  ;;  %1093 = vmatpush.bf16.msrb.mxu0 %v1633_v50  ;;  %v2101_v46 = vor.u32 %v2368_v36, %v2098_v37  ;;  %v1685_v50 = vor.u32 %v2264_v38, %v1682_v40  ;;  %v2280_v30 = vld [vmem:[#allocation4 + $0x12c] sm:$0xf]  ;;  %v1621_v36 = vor.u32 %v2248_v28, %v1618_v29 }
  0xad   :  { %1106 = vmatpush.bf16.msrb.mxu1 %v1761_v51  ;;  %v1813_v51 = vor.u32 %v2296_v41, %v1810_v43  ;;  %v1749_v37 = vor.u32 %v2280_v30, %v1746_v31  ;;  %v2348_v38 = vld [vmem:[#allocation4 + $0x34c] sm:$0xf]  ;;  %v1602_v41 = vld [vmem:[#allocation4 + $0x18] sm:$0xf0] }
  0xae   :  { %1070 = vmatmul.bf16.vlgmr.msra.gmra.mxu2 %v2568_v5  ;;  %v2244_v40 = vld [vmem:[#allocation4 + $0xc] sm:$0xf]  ;;  %v2390_v30 = vld [vmem:[%s2705_s5 + $0x98] sm:$0xff] }
  0xaf   :  { %1083 = vmatmul.bf16.vlgmr.msra.gmra.mxu3 %v2570_v11  ;;  %1118 = vmatpush.bf16.msrb.mxu2 %v1905_v58  ;;  %v1957_v58 = vor.u32 %v2332_v48, %v1954_v49  ;;  %v2276_v43 = vld [vmem:[#allocation4 + $0x10c] sm:$0xf]  ;;  %v1874_v49 = vld [vmem:[#allocation4 + $0x238] sm:$0xf0] }
  0xb0   :  { %1131 = vmatpush.bf16.msrb.mxu3 %v2033_v59  ;;  %1094 = vmatpush.bf16.msrb.mxu0 %v1617_v63  ;;  %v2085_v59 = vor.u32 %v2364_v52, %v2082_v53  ;;  %v1797_v63 = vor.u32 %v2292_v56, %v1794_v57  ;;  %v2312_v48 = vld [vmem:[#allocation4 + $0x22c] sm:$0xf]  ;;  %v2002_v53 = vld [vmem:[#allocation4 + $0x338] sm:$0xf0] }
  0xb1   :  { %1107 = vmatpush.bf16.msrb.mxu1 %v1745_v0  ;;  %v2360_v0 = vld [vmem:[#allocation4 + $0x3ac] sm:$0xf]  ;;  %v1877_v54 = vor.u32 %v2312_v48, %v1874_v49  ;;  %v1858_v57 = vld [vmem:[#allocation4 + $0x218] sm:$0xf0] }
  0xb2   :  { %v2344_v52 = vld [vmem:[#allocation4 + $0x32c] sm:$0xf]  ;;  %v2402_v48 = vld [vmem:[%s2705_s5 + $0xf8] sm:$0xff] }
  0xb3   :  { %1119 = vmatpush.bf16.msrb.mxu2 %v1889_v8  ;;  %v2069_v8 = vor.u32 %v2360_v0, %v2066_v1  ;;  %v2005_v55 = vor.u32 %v2344_v52, %v2002_v53  ;;  %v2308_v56 = vld [vmem:[#allocation4 + $0x20c] sm:$0xf] }
  0xb4   :  { %1132 = vmatpush.bf16.msrb.mxu3 %v2017_v13  ;;  %1095 = vmatpush.bf16.msrb.mxu0 %v1601_v16  ;;  %v1781_v13 = vor.u32 %v2288_v4, %v1778_v6  ;;  %v2252_v16 = vld [vmem:[#allocation4 + $0x4c] sm:$0xf]  ;;  %v1861_v60 = vor.u32 %v2308_v56, %v1858_v57  ;;  %v2371_v4 = vld [vmem:[%s2705_s5] sm:$0xff] }
  0xb5   :  { %1108 = vmatpush.bf16.msrb.mxu1 %v1729_v17  ;;  %v1634_v17 = vld [vmem:[#allocation4 + $0x58] sm:$0xf0]  ;;  %v2373_v0 = vld [vmem:[%s2705_s5 + $0x10] sm:$0xff]  ;;  %v2372_v2 = vld [vmem:[%s2705_s5 + $0x8] sm:$0xff] }
  0xb6   :  { %v1637_v24 = vor.u32 %v2252_v16, %v1634_v17  ;;  %v2385_v1 = vld [vmem:[%s2705_s5 + $0x70] sm:$0xff]  ;;  %v2384_v3 = vld [vmem:[%s2705_s5 + $0x68] sm:$0xff]  ;;  %v2383_v6 = vld [vmem:[%s2705_s5 + $0x60] sm:$0xff] }
  0xb7   :  { %1120 = vmatpush.bf16.msrb.mxu2 %v1873_v23  ;;  %1096 = vmatmul.bf16.vlgmr.msrb.gmra.mxu0 %v2562_v42  ;;  %v1906_v23 = vld [vmem:[#allocation4 + $0x278] sm:$0xf0]  ;;  %v2380_v19 = vld [vmem:[%s2705_s5 + $0x48] sm:$0xff] }
  0xb8   :  { %1140 = vmatpush.bf16.msra.mxu0 %v1717_v20  ;;  %1133 = vmatpush.bf16.msrb.mxu3 %v2001_v27  ;;  %v1925_v20 = vor.u32 %v2324_v9, %v1922_v10  ;;  %v2034_v27 = vld [vmem:[#allocation4 + $0x378] sm:$0xf0]  ;;  %v1909_v32 = vor.u32 %v2320_v22, %v1906_v23 }
  0xb9   :  { %1153 = vmatpush.bf16.msra.mxu1 %v1845_v21  ;;  %v2053_v21 = vor.u32 %v2356_v14, %v2050_v15  ;;  %v2037_v33 = vor.u32 %v2352_v26, %v2034_v27  ;;  %v2382_v10 = vld [vmem:[%s2705_s5 + $0x58] sm:$0xff]  ;;  %v2381_v14 = vld [vmem:[%s2705_s5 + $0x50] sm:$0xff]  ;;  %v2379_v23 = vld [vmem:[%s2705_s5 + $0x40] sm:$0xff] }
  0xba   :  { %1109 = vmatmul.bf16.vlgmr.msrb.gmra.mxu1 %v2564_v47  ;;  %v2393_v15 = vld [vmem:[%s2705_s5 + $0xb0] sm:$0xff] }
  0xbb   :  { %1121 = vmatpush.bf16.msrb.mxu2 %v1857_v39  ;;  %v2018_v39 = vld [vmem:[#allocation4 + $0x358] sm:$0xf0] }
  0xbc   :  { %1141 = vmatpush.bf16.msra.mxu0 %v1701_v34  ;;  %1134 = vmatpush.bf16.msrb.mxu3 %v1985_v44  ;;  %v2316_v34 = vld [vmem:[#allocation4 + $0x24c] sm:$0xf]  ;;  %v1730_v44 = vld [vmem:[#allocation4 + $0x118] sm:$0xf0] }
  0xbd   :  { %1154 = vmatpush.bf16.msra.mxu1 %v1829_v35  ;;  %v1890_v35 = vld [vmem:[#allocation4 + $0x258] sm:$0xf0] }
  0xbe   :  { %1122 = vmatmul.bf16.vlgmr.msrb.gmra.mxu2 %v2568_v5 }
  0xbf   :  { %1166 = vmatpush.bf16.msra.mxu2 %v1973_v45  ;;  %1135 = vmatmul.bf16.vlgmr.msrb.gmra.mxu3 %v2570_v11  ;;  %v1893_v45 = vor.u32 %v2316_v34, %v1890_v35  ;;  %v2389_v34 = vld [vmem:[%s2705_s5 + $0x90] sm:$0xff] }
  0xc0   :  { %1179 = vmatpush.bf16.msra.mxu3 %v2101_v46  ;;  %1142 = vmatpush.bf16.msra.mxu0 %v1685_v50  ;;  %v2021_v46 = vor.u32 %v2348_v38, %v2018_v39  ;;  %v1605_v50 = vor.u32 %v2244_v40, %v1602_v41  ;;  %v2388_v39 = vld [vmem:[%s2705_s5 + $0x88] sm:$0xff] }
  0xc1   :  { %1155 = vmatpush.bf16.msra.mxu1 %v1813_v51  ;;  %v1733_v51 = vor.u32 %v2276_v43, %v1730_v44 }
  0xc3   :  { %1167 = vmatpush.bf16.msra.mxu2 %v1957_v58  ;;  %v2340_v58 = vld [vmem:[#allocation4 + $0x30c] sm:$0xf] }
  0xc4   :  { %1180 = vmatpush.bf16.msra.mxu3 %v2085_v59  ;;  %1143 = vmatpush.bf16.msra.mxu0 %v1669_v62  ;;  %v1986_v59 = vld [vmem:[#allocation4 + $0x318] sm:$0xf0] }
  0xc5   :  { %1156 = vmatpush.bf16.msra.mxu1 %v1797_v63  ;;  %v1989_v61 = vor.u32 %v2340_v58, %v1986_v59  ;;  %v2378_v62 = vld [vmem:[%s2705_s5 + $0x38] sm:$0xff]  ;;  %v2377_v63 = vld [vmem:[%s2705_s5 + $0x30] sm:$0xff]  ;;  %v2400_v59 = vld [vmem:[%s2705_s5 + $0xe8] sm:$0xff] }
  0xc7   :  { %1168 = vmatpush.bf16.msra.mxu2 %v1941_v7  ;;  %v2625_v7 = vld [vmem:[%s2704_s4] sm:$0xf] }
  0xc8   :  { %1181 = vmatpush.bf16.msra.mxu3 %v2069_v8  ;;  %1144 = vmatpush.bf16.msra.mxu0 %v1653_v12  ;;  %v2394_v12 = vld [vmem:[%s2705_s5 + $0xb8] sm:$0xff]  ;;  %v338_v57 = vperm.slane %v2625_v7, 2 }
  0xc9   :  { %1157 = vmatpush.bf16.msra.mxu1 %v1781_v13  ;;  %v336_v13 = vperm.slane %v2625_v7, 0 }
  0xcb   :  { %1169 = vmatpush.bf16.msra.mxu2 %v1925_v20  ;;  %v2392_v20 = vld [vmem:[%s2705_s5 + $0xa8] sm:$0xff] }
  0xcc   :  { %1182 = vmatpush.bf16.msra.mxu3 %v2053_v21  ;;  %1145 = vmatpush.bf16.msra.mxu0 %v1637_v24  ;;  %v2391_v24 = vld [vmem:[%s2705_s5 + $0xa0] sm:$0xff] }
  0xcd   :  { %1158 = vmatpush.bf16.msra.mxu1 %v1765_v25 }
  0xcf   :  { %1170 = vmatpush.bf16.msra.mxu2 %v1909_v32  ;;  %v337_v32 = vperm.slane %v2625_v7, 1 }
  0xd0   :  { %1183 = vmatpush.bf16.msra.mxu3 %v2037_v33  ;;  %1146 = vmatpush.bf16.msra.mxu0 %v1621_v36 }
  0xd1   :  { %1159 = vmatpush.bf16.msra.mxu1 %v1749_v37 }
  0xd3   :  { %1171 = vmatpush.bf16.msra.mxu2 %v1893_v45 }
  0xd4   :  { %1184 = vmatpush.bf16.msra.mxu3 %v2021_v46  ;;  %1147 = vmatpush.bf16.msra.mxu0 %v1605_v50  ;;  %v2387_v46 = vld [vmem:[%s2705_s5 + $0x80] sm:$0xff] }
  0xd5   :  { %1160 = vmatpush.bf16.msra.mxu1 %v1733_v51 }
  0xd7   :  { %1172 = vmatpush.bf16.msra.mxu2 %v1877_v54  ;;  %1148 = vmatmul.bf16.vlgmr.msra.gmra.mxu0 %v2562_v42  ;;  %v2376_v42 = vld [vmem:[%s2705_s5 + $0x28] sm:$0xff]  ;;  %v2401_v54 = vld [vmem:[%s2705_s5 + $0xf0] sm:$0xff] }
  0xd8   :  { %1185 = vmatpush.bf16.msra.mxu3 %v2005_v55  ;;  %1161 = vmatmul.bf16.vlgmr.msra.gmra.mxu1 %v2564_v47  ;;  %v2375_v47 = vld [vmem:[%s2705_s5 + $0x20] sm:$0xff] }
  0xd9   :  { %1476 = vmatpush.bf16.msrb.mxu0 %v2378_v62 }
  0xdb   :  { %1173 = vmatpush.bf16.msra.mxu2 %v1861_v60 }
  0xdc   :  { %1186 = vmatpush.bf16.msra.mxu3 %v1989_v61 }
  0xdd   :  { %1477 = vmatpush.bf16.msrb.mxu0 %v2377_v63  ;;  %v2399_v63 = vld [vmem:[%s2705_s5 + $0xe0] sm:$0xff] }
  0xde   :  { %1174 = vmatmul.bf16.vlgmr.msra.gmra.mxu2 %v2568_v5  ;;  %v2374_v5 = vld [vmem:[%s2705_s5 + $0x18] sm:$0xff] }
  0xdf   :  { %1187 = vmatmul.bf16.vlgmr.msra.gmra.mxu3 %v2570_v11  ;;  %v2386_v11 = vld [vmem:[%s2705_s5 + $0x78] sm:$0xff]  ;;  %1502 = vmatpush.bf16.msrb.mxu2 %v2394_v12  ;;  %v2396_v12 = vld [vmem:[%s2705_s5 + $0xc8] sm:$0xff] }
  0xe0   :  { %1489 = vmatpush.bf16.msrb.mxu1 %v2386_v11  ;;  %1515 = vmatpush.bf16.msrb.mxu3 %v2402_v48 }
  0xe1   :  { %1478 = vmatpush.bf16.msrb.mxu0 %v2376_v42 }
  0xe3   :  { %1503 = vmatpush.bf16.msrb.mxu2 %v2393_v15  ;;  %v2395_v15 = vld [vmem:[%s2705_s5 + $0xc0] sm:$0xff] }
  0xe4   :  { %1490 = vmatpush.bf16.msrb.mxu1 %v2385_v1  ;;  %1516 = vmatpush.bf16.msrb.mxu3 %v2401_v54  ;;  %v2398_v1 = vld [vmem:[%s2705_s5 + $0xd8] sm:$0xff]  ;;  %v2407_v54 = vld [vmem:[%s2707_s7] ss:$0 sm:$0xff] }
  0xe5   :  { %1479 = vmatpush.bf16.msrb.mxu0 %v2375_v47 }
  0xe7   :  { %1504 = vmatpush.bf16.msrb.mxu2 %v2392_v20 }
  0xe8   :  { %1491 = vmatpush.bf16.msrb.mxu1 %v2384_v3  ;;  %1517 = vmatpush.bf16.msrb.mxu3 %v2400_v59  ;;  %v2408_v59 = vld [vmem:[#allocation3] ss:$0 sm:$0xff] }
  0xe9   :  { %1480 = vmatpush.bf16.msrb.mxu0 %v2374_v5 }
  0xeb   :  { %1505 = vmatpush.bf16.msrb.mxu2 %v2391_v24 }
  0xec   :  { %1492 = vmatpush.bf16.msrb.mxu1 %v2383_v6  ;;  %1518 = vmatpush.bf16.msrb.mxu3 %v2399_v63 }
  0xed   :  { %1481 = vmatpush.bf16.msrb.mxu0 %v2373_v0 }
  0xef   :  { %1506 = vmatpush.bf16.msrb.mxu2 %v2390_v30 }
  0xf0   :  { %1493 = vmatpush.bf16.msrb.mxu1 %v2382_v10  ;;  %1519 = vmatpush.bf16.msrb.mxu3 %v2398_v1 }
  0xf1   :  { %1482 = vmatpush.bf16.msrb.mxu0 %v2372_v2 }
  0xf3   :  { %1507 = vmatpush.bf16.msrb.mxu2 %v2389_v34 }
  0xf4   :  { %1494 = vmatpush.bf16.msrb.mxu1 %v2381_v14 }
  0xf5   :  { %1483 = vmatpush.bf16.msrb.mxu0 %v2371_v4 }
  0xf7   :  { %1508 = vmatpush.bf16.msrb.mxu2 %v2388_v39 }
  0xf8   :  { %1495 = vmatpush.bf16.msrb.mxu1 %v2380_v19 }
  0xfb   :  { %1509 = vmatpush.bf16.msrb.mxu2 %v2387_v46 }
  0xfc   :  { %1496 = vmatpush.bf16.msrb.mxu1 %v2379_v23 }
 0x113   :  { %v993_v8 = vpop.f32.mrf.mxu0 }
 0x114   :  { %v1006_v9 = vpop.f32.mrf.mxu1  ;;  %v994_v16 = vadd.f32 %v993_v8, %v336_v13 }
 0x116   :  { %v1007_v21 = vadd.f32 %v1006_v9, %v994_v16  ;;  %v2397_v9 = vld [vmem:[%s2705_s5 + $0xd0] sm:$0xff] }
 0x117   :  { %1520 = vmatpush.bf16.msrb.mxu3 %v2397_v9 }
 0x11b   :  { %v995_v17 = vpop.f32.mrf.mxu0  ;;  %1521 = vmatpush.bf16.msrb.mxu3 %v2396_v12 }
 0x11c   :  { %v1008_v18 = vpop.f32.mrf.mxu1 }
 0x11f   :  { %1522 = vmatpush.bf16.msrb.mxu3 %v2395_v15 }
 0x121   :  { %v1019_v22 = vpop.f32.mrf.mxu2 }
 0x122   :  { %v1020_v25 = vadd.f32 %v1019_v22, %v1007_v21  ;;  %v1032_v26 = vpop.f32.mrf.mxu3  ;;  %v339_v22 = vperm.slane %v2625_v7, 3 }
 0x123   :  { %v1045_v28 = vpop.f32.mrf.mxu0 }
 0x124   :  { %v1033_v27 = vadd.f32 %v1032_v26, %v1020_v25  ;;  %v1058_v29 = vpop.f32.mrf.mxu1  ;;  %v1046_v36 = vadd.f32 %v1045_v28, %v337_v32 }
 0x126   :  { %v1196_v31 = vmul.f32 1.442695, %v1033_v27  ;;  %vm1192_vm1 = vcmp.gt.f32.partialorder %v1033_v27, 0.0  ;;  %v1059_v43 = vadd.f32 %v1058_v29, %v1046_v36 }
 0x128   :  { %2409 = vpow2.f32 %v1196_v31 }
 0x129   :  { %v1021_v33 = vpop.f32.mrf.mxu2 }
 0x12a   :  { %v1034_v35 = vpop.f32.mrf.mxu3 }
 0x12b   :  { %v1047_v37 = vpop.f32.mrf.mxu0 }
 0x12c   :  { %v1060_v38 = vpop.f32.mrf.mxu1 }
 0x12e   :  { %v2410_v40 = vpop.eup %2409 }
 0x12f   :  { %v2102_v41 = vadd.f32 -1.0, %v2410_v40 }
 0x131   :  { %v1208_v44 = vsel %vm1192_vm1, %v1033_v27, %v2102_v41  ;;  %v1071_v45 = vpop.f32.mrf.mxu2 }
 0x132   :  { %v1212_v49 = vpack.c.bf16 %v1208_v44, %v1208_v44  ;;  %v1072_v50 = vadd.f32 %v1071_v45, %v1059_v43  ;;  %v1084_v51 = vpop.f32.mrf.mxu3  ;;  %v2406_v44 = vld [vmem:[%s2706_s6] ss:$0 sm:$0xff] }
 0x134   :  { %v1085_v52 = vadd.f32 %v1084_v51, %v1072_v50  ;;  %1484 = vmatmul.bf16.vlgmr.msrb.gmra.mxu0 %v1212_v49  ;;  %v1097_v53 = vpop.f32.mrf.mxu0 }
 0x135   :  { %v1098_v61 = vadd.f32 %v1097_v53, %v338_v57 }
 0x136   :  { %v1198_v55 = vmul.f32 1.442695, %v1085_v52  ;;  %vm1193_vm2 = vcmp.gt.f32.partialorder %v1085_v52, 0.0 }
 0x137   :  { %v1110_v56 = vpop.f32.mrf.mxu1 }
 0x138   :  { %2411 = vpow2.f32 %v1198_v55  ;;  %v1111_v0 = vadd.f32 %v1110_v56, %v1098_v61 }
 0x139   :  { %v1073_v58 = vpop.f32.mrf.mxu2 }
 0x13a   :  { %v1086_v60 = vpop.f32.mrf.mxu3 }
 0x13c   :  { %v1099_v62 = vpop.f32.mrf.mxu0 }
 0x13e   :  { %v2412_v42 = vpop.eup %2411 }
 0x13f   :  { %v1112_v47 = vpop.f32.mrf.mxu1  ;;  %v2103_v5 = vadd.f32 -1.0, %v2412_v42 }
 0x141   :  { %v1209_v11 = vsel %vm1193_vm2, %v1085_v52, %v2103_v5  ;;  %v1123_v3 = vpop.f32.mrf.mxu2 }
 0x142   :  { %v1213_v2 = vpack.c.bf16 %v1209_v11, %v1209_v11  ;;  %v1136_v4 = vpop.f32.mrf.mxu3  ;;  %v1124_v6 = vadd.f32 %v1123_v3, %v1111_v0 }
 0x144   :  { %1497 = vmatmul.bf16.vlgmr.msrb.gmra.mxu1 %v1213_v2  ;;  %v1137_v8 = vadd.f32 %v1136_v4, %v1124_v6 }
 0x146   :  { %v1200_v10 = vmul.f32 1.442695, %v1137_v8  ;;  %vm1194_vm3 = vcmp.gt.f32.partialorder %v1137_v8, 0.0 }
 0x148   :  { %2413 = vpow2.f32 %v1200_v10 }
 0x149   :  { %v1125_v13 = vpop.f32.mrf.mxu2 }
 0x14a   :  { %v1138_v14 = vpop.f32.mrf.mxu3 }
 0x14e   :  { %v2414_v16 = vpop.eup %2413 }
 0x14f   :  { %v2104_v17 = vadd.f32 -1.0, %v2414_v16 }
 0x151   :  { %v1210_v18 = vsel %vm1194_vm3, %v1137_v8, %v2104_v17 }
 0x152   :  { %v1214_v20 = vpack.c.bf16 %v1210_v18, %v1210_v18 }
 0x154   :  { %v1149_v19 = vpop.f32.mrf.mxu0  ;;  %1510 = vmatmul.bf16.vlgmr.msrb.gmra.mxu2 %v1214_v20 }
 0x155   :  { %v1162_v21 = vpop.f32.mrf.mxu1  ;;  %v1150_v23 = vadd.f32 %v1149_v19, %v339_v22 }
 0x157   :  { %v1163_v26 = vadd.f32 %v1162_v21, %v1150_v23 }
 0x15c   :  { %v1151_v24 = vpop.f32.mrf.mxu0 }
 0x15d   :  { %v1164_v25 = vpop.f32.mrf.mxu1 }
 0x161   :  { %v1175_v27 = vpop.f32.mrf.mxu2 }
 0x162   :  { %v1176_v28 = vadd.f32 %v1175_v27, %v1163_v26  ;;  %v1188_v29 = vpop.f32.mrf.mxu3 }
 0x164   :  { %v1189_v30 = vadd.f32 %v1188_v29, %v1176_v28 }
 0x166   :  { %v1202_v31 = vmul.f32 1.442695, %v1189_v30  ;;  %vm1195_vm4 = vcmp.gt.f32.partialorder %v1189_v30, 0.0 }
 0x168   :  { %2415 = vpow2.f32 %v1202_v31 }
 0x169   :  { %v1177_v32 = vpop.f32.mrf.mxu2 }
 0x16a   :  { %v1190_v33 = vpop.f32.mrf.mxu3 }
 0x16e   :  { %v2416_v34 = vpop.eup %2415 }
 0x16f   :  { %v2105_v35 = vadd.f32 -1.0, %v2416_v34 }
 0x171   :  { %v1211_v36 = vsel %vm1195_vm4, %v1189_v30, %v2105_v35 }
 0x172   :  { %v1215_v37 = vpack.c.bf16 %v1211_v36, %v1211_v36 }
 0x174   :  { %1523 = vmatmul.bf16.vlgmr.msrb.gmra.mxu3 %v1215_v37 }
 0x1b1   :  { %v1485_v7 = vpop.f32.mrf.mxu0 }
 0x1b2   :  { %v1486_v45 = vadd.f32 %v2406_v44, %v1485_v7 }
 0x1b9   :  { %v1487_v38 = vpop.f32.mrf.mxu0 }
 0x1c1   :  { %v1498_v39 = vpop.f32.mrf.mxu1 }
 0x1c2   :  { %v1499_v46 = vadd.f32 %v1498_v39, %v1486_v45 }
 0x1c9   :  { %v1500_v40 = vpop.f32.mrf.mxu1 }
 0x1d7   :  { %v1511_v41 = vpop.f32.mrf.mxu2 }
 0x1d8   :  { %v1512_v48 = vadd.f32 %v1511_v41, %v1499_v46 }
 0x1df   :  { %v1513_v43 = vpop.f32.mrf.mxu2 }
 0x1f7   :  { %v1524_v49 = vpop.f32.mrf.mxu3 }
 0x1f8   :  { %v1525_v50 = vadd.f32 %v1524_v49, %v1512_v48 }
 0x1fa   :  { %v1529_v51 = vmul.f32 1.442695, %v1525_v50  ;;  %vm1528_vm5 = vcmp.gt.f32.partialorder %v1525_v50, 0.0 }
 0x1fc   :  { %2417 = vpow2.f32 %v1529_v51 }
 0x1ff   :  { %v1526_v52 = vpop.f32.mrf.mxu3 }
 0x202   :  { %v2418_v53 = vpop.eup %2417 }
 0x203   :  { %v2234_v55 = vadd.f32 -1.0, %v2418_v53 }
 0x205   :  { %v1532_v56 = vsel %vm1528_vm5, %v1525_v50, %v2234_v55 }
 0x206   :  { %v1537_v57 = vmul.f32 %v2407_v54, %v1532_v56 }
 0x208   :  { %v1539_v58 = vsel %vm1538_vm6, %v1537_v57, 0.0 }
 0x209   :  { %1540 = vadd.xlane.f32.xlu0 %v1539_v58 }
 0x27c   :  { %v1541_v60 = vpop.xlane.xlu0 %1540 }
 0x27d   :  { %v1546_v61 = vadd.f32 %v2408_v59, %v1541_v60 }
 0x27f   :  { %1548 = vst.msk [vmem:[%s2709_s9] sm:$0xff] %vm1547_vm7, %v1546_v61 }
 0x280   :  { %1553 = vsyncpa [#allocation5], 1 }

</bundles_post_ra>
